<compile_context>
chip_gen: v7x
topology: tpu7x:2x2x1
jax: 0.10.0
libtpu: 0.0.40
codegen_flags: <defaults>
</compile_context>

<pallas_src>
import functools

import jax
import jax.numpy as jnp
from jax.experimental import pallas as pl
from jax.experimental.pallas import tpu as pltpu

LN_EPS = 1e-5  # PyTorch nn.LayerNorm default eps


# ---------------------------------------------------------------------------
# In-kernel math helpers (trace-time; lower to VPU/EUP/MXU ops)
# ---------------------------------------------------------------------------
def _recip(x):
    # EUP approximate reciprocal + one Newton-Raphson step -> ~f32 accuracy,
    # keeps the divide off the VALU slot.
    r = pl.reciprocal(x, approx=True)
    return r * (2.0 - x * r)


def _erf(x):
    # Abramowitz & Stegun 7.1.26 rational approximation (|err| < 1.5e-7),
    # built from exp/mul/add/reciprocal only so it lowers cleanly in Mosaic.
    a1, a2, a3, a4, a5 = 0.254829592, -0.284496736, 1.421413741, -1.453152027, 1.061405429
    p = 0.3275911
    s = jnp.where(x < 0.0, -1.0, 1.0)
    ax = jnp.abs(x)
    t = _recip(1.0 + p * ax)
    poly = ((((a5 * t + a4) * t + a3) * t + a2) * t + a1) * t
    return s * (1.0 - poly * jnp.exp(-ax * ax))


def _gelu_exact(x):
    # matches PyTorch nn.GELU() (erf formulation) to ~1e-7
    return 0.5 * x * (1.0 + _erf(x * 0.7071067811865475))


def _layernorm(x, gamma, beta):
    mu = jnp.mean(x, axis=-1, keepdims=True)
    var = jnp.mean((x - mu) ** 2, axis=-1, keepdims=True)
    return (x - mu) * jax.lax.rsqrt(var + LN_EPS) * gamma + beta


# ---------------------------------------------------------------------------
# Fused kernel: one grid step == (one batch tile, one transformer layer)
# ---------------------------------------------------------------------------
def transformer_kernel(x_ref, ln1_g_ref, ln1_b_ref, wqkv_ref, wo_ref, bo_ref,
                       ln2_g_ref, ln2_b_ref, w1_ref, b1_ref, w2_ref, b2_ref,
                       o_ref, *, heads, dim_head, compute_dtype):
    layer = pl.program_id(1)

    # Residual stream is carried in the (resident) output block across the depth axis.
    @pl.when(layer == 0)
    def _():
        o_ref[...] = x_ref[...]

    Bt, N, D = o_ref.shape
    inner = heads * dim_head
    scale = dim_head ** (-0.5)

    x = o_ref[...].astype(jnp.float32).reshape(Bt * N, D)          # residual stream (f32)

    # ---------------- PreNorm + Attention + residual ----------------
    xn = _layernorm(x, ln1_g_ref[0], ln1_b_ref[0])                 # (Bt*N, D)
    qkv = jnp.dot(xn.astype(compute_dtype), wqkv_ref[0].astype(compute_dtype),
                  preferred_element_type=jnp.float32)              # (Bt*N, 3*inner)
    qkv3 = qkv.reshape(Bt, N, 3 * inner)

    wo = wo_ref[0].astype(compute_dtype)                           # (inner, D)
    attn_out = jnp.zeros((Bt * N, D), jnp.float32)
    for h in range(heads):
        lo = h * dim_head
        hi = lo + dim_head
        q = qkv3[:, :, lo:hi] * scale                              # scale folded into q (not dots)
        k = qkv3[:, :, inner + lo:inner + hi]
        v = qkv3[:, :, 2 * inner + lo:2 * inner + hi]
        dots = jnp.einsum("bnd,bmd->bnm", q.astype(compute_dtype), k.astype(compute_dtype),
                          preferred_element_type=jnp.float32)      # (Bt, N, N)
        dots = dots - jnp.max(dots, axis=-1, keepdims=True)        # stable softmax
        e = jnp.exp(dots)
        p = e * _recip(jnp.sum(e, axis=-1, keepdims=True))
        o_h = jnp.einsum("bnm,bmd->bnd", p.astype(compute_dtype), v.astype(compute_dtype),
                         preferred_element_type=jnp.float32)       # (Bt, N, dim_head)
        # Fuse the output projection per head -> no lane-axis concat of head outputs.
        attn_out = attn_out + jnp.dot(
            o_h.reshape(Bt * N, dim_head).astype(compute_dtype),
            wo[lo:hi, :], preferred_element_type=jnp.float32)

    x = x + attn_out + bo_ref[0]                                   # residual + output bias

    # ---------------- PreNorm + FeedForward + residual ----------------
    xn2 = _layernorm(x, ln2_g_ref[0], ln2_b_ref[0])
    hmid = jnp.dot(xn2.astype(compute_dtype), w1_ref[0].astype(compute_dtype),
                   preferred_element_type=jnp.float32) + b1_ref[0]
    hmid = _gelu_exact(hmid)
    y = jnp.dot(hmid.astype(compute_dtype), w2_ref[0].astype(compute_dtype),
                preferred_element_type=jnp.float32) + b2_ref[0]
    x = x + y

    o_ref[...] = x.reshape(Bt, N, D).astype(o_ref.dtype)


# ---------------------------------------------------------------------------
# pallas_call wrapper (single call for the whole depth loop)
# ---------------------------------------------------------------------------
def transformer_pallas(x, params, *, heads, dim_head, batch_tile=None,
                       compute_dtype=jnp.float32):
    B, N, D = x.shape
    L = len(params)
    Bt = B if batch_tile is None else batch_tile
    assert B % Bt == 0, "batch_tile must divide the batch size"

    # Stack per-layer weights along a leading depth axis so the depth grid axis
    # auto-pipelines next-layer weight DMA under current-layer compute.
    def stack(name):
        return jnp.stack([p[name] for p in params], axis=0)

    ln1_g, ln1_b = stack("ln1_g"), stack("ln1_b")                  # (L, 1, D)
    w_qkv = stack("w_qkv")                                         # (L, D, 3*inner)
    w_out, b_out = stack("w_out"), stack("b_out")                  # (L, inner, D), (L, 1, D)
    ln2_g, ln2_b = stack("ln2_g"), stack("ln2_b")                  # (L, 1, D)
    w1, b1 = stack("w1"), stack("b1")                              # (L, D, H), (L, 1, H)
    w2, b2 = stack("w2"), stack("b2")                              # (L, H, D), (L, 1, D)

    def wspec(arr):
        nd = arr.ndim
        return pl.BlockSpec((1,) + arr.shape[1:], lambda b, l, _nd=nd: (l,) + (0,) * (_nd - 1))

    act_spec = pl.BlockSpec((Bt, N, D), lambda b, l: (b, 0, 0))

    kernel = functools.partial(transformer_kernel, heads=heads, dim_head=dim_head,
                               compute_dtype=compute_dtype)

    return pl.pallas_call(
        kernel,
        out_shape=jax.ShapeDtypeStruct((B, N, D), x.dtype),
        grid=(B // Bt, L),
        in_specs=[
            act_spec,
            wspec(ln1_g), wspec(ln1_b), wspec(w_qkv), wspec(w_out), wspec(b_out),
            wspec(ln2_g), wspec(ln2_b), wspec(w1), wspec(b1), wspec(w2), wspec(b2),
        ],
        out_specs=act_spec,
        compiler_params=pltpu.CompilerParams(
            dimension_semantics=("parallel", "arbitrary")),
    )(x, ln1_g, ln1_b, w_qkv, w_out, b_out, ln2_g, ln2_b, w1, b1, w2, b2)


# ---------------------------------------------------------------------------
# Pure-JAX reference (for correctness check)
# ---------------------------------------------------------------------------
def _layernorm_ref(x, g, b):
    mu = jnp.mean(x, axis=-1, keepdims=True)
    var = jnp.mean((x - mu) ** 2, axis=-1, keepdims=True)
    return (x - mu) / jnp.sqrt(var + LN_EPS) * g + b


def transformer_ref(x, params, *, heads, dim_head):
    scale = dim_head ** (-0.5)
    for layer in params:
        # attention
        xn = _layernorm_ref(x, layer["ln1_g"], layer["ln1_b"])
        qkv = xn @ layer["w_qkv"]                                  # (B, N, 3*inner)
        q, k, v = jnp.split(qkv, 3, axis=-1)
        B, N, _ = q.shape

        def split_heads(t):
            return t.reshape(B, N, heads, dim_head).transpose(0, 2, 1, 3)
        q, k, v = map(split_heads, (q, k, v))
        dots = jnp.einsum("bhnd,bhmd->bhnm", q, k) * scale
        attn = jax.nn.softmax(dots, axis=-1)
        out = jnp.einsum("bhnm,bhmd->bhnd", attn, v)
        out = out.transpose(0, 2, 1, 3).reshape(B, N, heads * dim_head)
        x = out @ layer["w_out"] + layer["b_out"] + x
        # feedforward (exact erf GELU, like nn.GELU())
        xn = _layernorm_ref(x, layer["ln2_g"], layer["ln2_b"])
        h = xn @ layer["w1"] + layer["b1"]
        h = 0.5 * h * (1.0 + jax.lax.erf(h * 0.7071067811865475))
        x = h @ layer["w2"] + layer["b2"] + x
    return x


# ---------------------------------------------------------------------------
# Deterministic parameter init
# ---------------------------------------------------------------------------
def init_params(key, depth, dim, heads, dim_head, mlp_dim):
    inner = heads * dim_head
    params = []
    for _ in range(depth):
        key, *ks = jax.random.split(key, 7)
        layer = {
            "ln1_g": jnp.ones((1, dim), jnp.float32),
            "ln1_b": jnp.zeros((1, dim), jnp.float32),
            "w_qkv": 0.1 * jax.random.normal(ks[0], (dim, 3 * inner), jnp.float32),
            "w_out": 0.1 * jax.random.normal(ks[1], (inner, dim), jnp.float32),
            "b_out": 0.1 * jax.random.normal(ks[2], (1, dim), jnp.float32),
            "ln2_g": jnp.ones((1, dim), jnp.float32),
            "ln2_b": jnp.zeros((1, dim), jnp.float32),
            "w1": 0.1 * jax.random.normal(ks[3], (dim, mlp_dim), jnp.float32),
            "b1": 0.1 * jax.random.normal(ks[4], (1, mlp_dim), jnp.float32),
            "w2": 0.1 * jax.random.normal(ks[5], (mlp_dim, dim), jnp.float32),
            "b2": jnp.zeros((1, dim), jnp.float32),
        }
        params.append(layer)
    return params


if __name__ == "__main__":
    # Small, consistent shapes: Transformer(dim=32, depth=2, heads=4, dim_head=8, mlp_dim=64)
    B, N, D = 2, 8, 32
    depth, heads, dim_head, mlp_dim = 2, 4, 8, 64

    key = jax.random.PRNGKey(0)
    kx, kp = jax.random.split(key)
    x = jax.random.normal(kx, (B, N, D), jnp.float32)
    params = init_params(kp, depth, D, heads, dim_head, mlp_dim)

    # f32 matmuls for the tolerance check; pass compute_dtype=jnp.bfloat16 for v6e/v7x MXU throughput.
    out = transformer_pallas(x, params, heads=heads, dim_head=dim_head,
                             compute_dtype=jnp.float32)
    out = jax.block_until_ready(out)

    ref = transformer_ref(x, params, heads=heads, dim_head=dim_head)
    assert out.shape == (B, N, D) and out.dtype == jnp.float32
    assert jnp.allclose(out, ref, rtol=1e-4, atol=2e-4), float(jnp.max(jnp.abs(out - ref)))

    print("KERNEL_OK")
</pallas_src>

<mosaic_0001>
module attributes {stable_mosaic.version = 11 : i64} {
  func.func @transformer_kernel(%arg0: i32, %arg1: i32, %arg2: memref<2x8x32xf32, #tpu.memory_space<vmem>>, %arg3: memref<1x1x32xf32, #tpu.memory_space<vmem>>, %arg4: memref<1x1x32xf32, #tpu.memory_space<vmem>>, %arg5: memref<1x32x96xf32, #tpu.memory_space<vmem>>, %arg6: memref<1x32x32xf32, #tpu.memory_space<vmem>>, %arg7: memref<1x1x32xf32, #tpu.memory_space<vmem>>, %arg8: memref<1x1x32xf32, #tpu.memory_space<vmem>>, %arg9: memref<1x1x32xf32, #tpu.memory_space<vmem>>, %arg10: memref<1x32x64xf32, #tpu.memory_space<vmem>>, %arg11: memref<1x1x64xf32, #tpu.memory_space<vmem>>, %arg12: memref<1x64x32xf32, #tpu.memory_space<vmem>>, %arg13: memref<1x1x32xf32, #tpu.memory_space<vmem>>, %arg14: memref<2x8x32xf32, #tpu.memory_space<vmem>>) attributes {dimension_semantics = [#tpu.dimension_semantics<parallel>, #tpu.dimension_semantics<arbitrary>], iteration_bounds = array<i64: 1, 2>, scalar_prefetch = 0 : i64, scratch_operands = 0 : i64, tpu.core_type = #tpu.core_type<tc>, window_params = [{transform_indices = @transform_0, window_bounds = array<i64: 2, 8, 32>}, {transform_indices = @transform_1, window_bounds = array<i64: 1, 1, 32>}, {transform_indices = @transform_2, window_bounds = array<i64: 1, 1, 32>}, {transform_indices = @transform_3, window_bounds = array<i64: 1, 32, 96>}, {transform_indices = @transform_4, window_bounds = array<i64: 1, 32, 32>}, {transform_indices = @transform_5, window_bounds = array<i64: 1, 1, 32>}, {transform_indices = @transform_6, window_bounds = array<i64: 1, 1, 32>}, {transform_indices = @transform_7, window_bounds = array<i64: 1, 1, 32>}, {transform_indices = @transform_8, window_bounds = array<i64: 1, 32, 64>}, {transform_indices = @transform_9, window_bounds = array<i64: 1, 1, 64>}, {transform_indices = @transform_10, window_bounds = array<i64: 1, 64, 32>}, {transform_indices = @transform_11, window_bounds = array<i64: 1, 1, 32>}, {transform_indices = @transform_12, window_bounds = array<i64: 2, 8, 32>}]} {
    %c0_i32 = arith.constant 0 : i32
    %0 = arith.cmpi eq, %arg1, %c0_i32 : i32
    %1 = arith.extui %0 : i1 to i32
    %c0_i32_0 = arith.constant 0 : i32
    %2 = arith.cmpi ne, %1, %c0_i32_0 : i32
    scf.if %2 {
      %c0_96 = arith.constant 0 : index
      %c0_97 = arith.constant 0 : index
      %c0_98 = arith.constant 0 : index
      %230 = vector.load %arg2[%c0_96, %c0_97, %c0_98] : memref<2x8x32xf32, #tpu.memory_space<vmem>>, vector<2x8x32xf32>
      %c0_99 = arith.constant 0 : index
      %c0_100 = arith.constant 0 : index
      %c0_101 = arith.constant 0 : index
      %231 = vector.load %arg14[%c0_99, %c0_100, %c0_101] : memref<2x8x32xf32, #tpu.memory_space<vmem>>, vector<2x8x32xf32>
      tpu.vector_store %arg14[%c0_99, %c0_100, %c0_101], %230 {strides = array<i32>} : memref<2x8x32xf32, #tpu.memory_space<vmem>>, vector<2x8x32xf32>,
    } else {
    }
    %c0 = arith.constant 0 : index
    %c0_1 = arith.constant 0 : index
    %c0_2 = arith.constant 0 : index
    %3 = vector.load %arg14[%c0, %c0_1, %c0_2] : memref<2x8x32xf32, #tpu.memory_space<vmem>>, vector<2x8x32xf32>
    %4 = vector.shape_cast %3 : vector<2x8x32xf32> to vector<16x32xf32>
    %c0_3 = arith.constant 0 : index
    %c0_4 = arith.constant 0 : index
    %c0_5 = arith.constant 0 : index
    %5 = vector.load %arg3[%c0_3, %c0_4, %c0_5] : memref<1x1x32xf32, #tpu.memory_space<vmem>>, vector<1x1x32xf32>
    %6 = vector.shape_cast %5 : vector<1x1x32xf32> to vector<1x32xf32>
    %c0_6 = arith.constant 0 : index
    %c0_7 = arith.constant 0 : index
    %c0_8 = arith.constant 0 : index
    %7 = vector.load %arg4[%c0_6, %c0_7, %c0_8] : memref<1x1x32xf32, #tpu.memory_space<vmem>>, vector<1x1x32xf32>
    %8 = vector.shape_cast %7 : vector<1x1x32xf32> to vector<1x32xf32>
    %cst = arith.constant dense<0.000000e+00> : vector<16xf32>
    %9 = vector.multi_reduction <add>, %4, %cst [1] : vector<16x32xf32> to vector<16xf32>
    %10 = vector.shape_cast %9 : vector<16xf32> to vector<16x1xf32>
    %cst_9 = arith.constant 3.200000e+01 : f32
    %11 = vector.broadcast %cst_9 : f32 to vector<16x1xf32>
    %12 = arith.divf %10, %11 : vector<16x1xf32>
    %13 = vector.broadcast %12 : vector<16x1xf32> to vector<16x32xf32>
    %14 = arith.subf %4, %13 : vector<16x32xf32>
    %15 = arith.mulf %14, %14 : vector<16x32xf32>
    %cst_10 = arith.constant dense<0.000000e+00> : vector<16xf32>
    %16 = vector.multi_reduction <add>, %15, %cst_10 [1] : vector<16x32xf32> to vector<16xf32>
    %17 = vector.shape_cast %16 : vector<16xf32> to vector<16x1xf32>
    %cst_11 = arith.constant 3.200000e+01 : f32
    %18 = vector.broadcast %cst_11 : f32 to vector<16x1xf32>
    %19 = arith.divf %17, %18 : vector<16x1xf32>
    %20 = vector.broadcast %12 : vector<16x1xf32> to vector<16x32xf32>
    %21 = arith.subf %4, %20 : vector<16x32xf32>
    %cst_12 = arith.constant 9.99999974E-6 : f32
    %22 = vector.broadcast %cst_12 : f32 to vector<16x1xf32>
    %23 = arith.addf %19, %22 : vector<16x1xf32>
    %24 = math.rsqrt %23 : vector<16x1xf32>
    %25 = vector.broadcast %24 : vector<16x1xf32> to vector<16x32xf32>
    %26 = arith.mulf %21, %25 : vector<16x32xf32>
    %27 = vector.broadcast %6 : vector<1x32xf32> to vector<16x32xf32>
    %28 = arith.mulf %26, %27 : vector<16x32xf32>
    %29 = vector.broadcast %8 : vector<1x32xf32> to vector<16x32xf32>
    %30 = arith.addf %28, %29 : vector<16x32xf32>
    %c0_13 = arith.constant 0 : index
    %c0_14 = arith.constant 0 : index
    %c0_15 = arith.constant 0 : index
    %31 = vector.load %arg5[%c0_13, %c0_14, %c0_15] : memref<1x32x96xf32, #tpu.memory_space<vmem>>, vector<1x32x96xf32>
    %32 = vector.shape_cast %31 : vector<1x32x96xf32> to vector<32x96xf32>
    %cst_16 = arith.constant dense<0.000000e+00> : vector<16x96xf32>
    %33 = tpu.matmul %30, %32, %cst_16 {dimension_numbers = #tpu.dot_dimension_numbers<[1], [0], [0], [1], [0, 0, 1, 1], [], []>} : vector<16x32xf32>, vector<32x96xf32>, vector<16x96xf32> -> vector<16x96xf32>
    %34 = vector.shape_cast %33 : vector<16x96xf32> to vector<2x8x96xf32>
    %c0_17 = arith.constant 0 : index
    %c0_18 = arith.constant 0 : index
    %c0_19 = arith.constant 0 : index
    %35 = vector.load %arg6[%c0_17, %c0_18, %c0_19] : memref<1x32x32xf32, #tpu.memory_space<vmem>>, vector<1x32x32xf32>
    %36 = vector.shape_cast %35 : vector<1x32x32xf32> to vector<32x32xf32>
    %cst_20 = arith.constant 0.000000e+00 : f32
    %37 = vector.broadcast %cst_20 : f32 to vector<16x32xf32>
    %38 = vector.extract_strided_slice %34 {offsets = [0, 0, 0], sizes = [2, 8, 8], strides = [1, 1, 1]} : vector<2x8x96xf32> to vector<2x8x8xf32>
    %cst_21 = arith.constant 0.353553385 : f32
    %39 = vector.broadcast %cst_21 : f32 to vector<2x8x8xf32>
    %40 = arith.mulf %38, %39 : vector<2x8x8xf32>
    %41 = vector.extract_strided_slice %34 {offsets = [0, 0, 32], sizes = [2, 8, 8], strides = [1, 1, 1]} : vector<2x8x96xf32> to vector<2x8x8xf32>
    %42 = vector.extract_strided_slice %34 {offsets = [0, 0, 64], sizes = [2, 8, 8], strides = [1, 1, 1]} : vector<2x8x96xf32> to vector<2x8x8xf32>
    "tpu.trace_start"() <{level = 10 : i32, message = "bnd,bmd->bnm"}> : () -> ()
    %cst_22 = arith.constant dense<0.000000e+00> : vector<2x8x8xf32>
    %43 = tpu.matmul %40, %41, %cst_22 {dimension_numbers = #tpu.dot_dimension_numbers<[2], [2], [1], [1], [0, 0, 0, 1, 1, 1], [0], [0]>} : vector<2x8x8xf32>, vector<2x8x8xf32>, vector<2x8x8xf32> -> vector<2x8x8xf32>
    "tpu.trace_stop"() : () -> ()
    %cst_23 = arith.constant dense<0xFF800000> : vector<2x8xf32>
    %44 = vector.multi_reduction <maximumf>, %43, %cst_23 [2] : vector<2x8x8xf32> to vector<2x8xf32>
    %45 = vector.shape_cast %44 : vector<2x8xf32> to vector<2x8x1xf32>
    %46 = vector.broadcast %45 : vector<2x8x1xf32> to vector<2x8x8xf32>
    %47 = arith.subf %43, %46 : vector<2x8x8xf32>
    %48 = math.exp %47 : vector<2x8x8xf32>
    %cst_24 = arith.constant dense<0.000000e+00> : vector<2x8xf32>
    %49 = vector.multi_reduction <add>, %48, %cst_24 [2] : vector<2x8x8xf32> to vector<2x8xf32>
    %50 = vector.shape_cast %49 : vector<2x8xf32> to vector<2x8x1xf32>
    %51 = tpu.reciprocal %50 {approx = true} : vector<2x8x1xf32> -> vector<2x8x1xf32>
    %52 = arith.mulf %50, %51 : vector<2x8x1xf32>
    %cst_25 = arith.constant 2.000000e+00 : f32
    %53 = vector.broadcast %cst_25 : f32 to vector<2x8x1xf32>
    %54 = arith.subf %53, %52 : vector<2x8x1xf32>
    %55 = arith.mulf %51, %54 : vector<2x8x1xf32>
    %56 = vector.broadcast %55 : vector<2x8x1xf32> to vector<2x8x8xf32>
    %57 = arith.mulf %48, %56 : vector<2x8x8xf32>
    "tpu.trace_start"() <{level = 10 : i32, message = "bnm,bmd->bnd"}> : () -> ()
    %cst_26 = arith.constant dense<0.000000e+00> : vector<2x8x8xf32>
    %58 = tpu.matmul %57, %42, %cst_26 {dimension_numbers = #tpu.dot_dimension_numbers<[2], [1], [1], [2], [0, 0, 0, 1, 1, 2], [0], [0]>} : vector<2x8x8xf32>, vector<2x8x8xf32>, vector<2x8x8xf32> -> vector<2x8x8xf32>
    "tpu.trace_stop"() : () -> ()
    %59 = vector.shape_cast %58 : vector<2x8x8xf32> to vector<16x8xf32>
    %60 = vector.extract_strided_slice %36 {offsets = [0, 0], sizes = [8, 32], strides = [1, 1]} : vector<32x32xf32> to vector<8x32xf32>
    %cst_27 = arith.constant dense<0.000000e+00> : vector<16x32xf32>
    %61 = tpu.matmul %59, %60, %cst_27 {dimension_numbers = #tpu.dot_dimension_numbers<[1], [0], [0], [1], [0, 0, 1, 1], [], []>} : vector<16x8xf32>, vector<8x32xf32>, vector<16x32xf32> -> vector<16x32xf32>
    %62 = arith.addf %37, %61 : vector<16x32xf32>
    %63 = vector.extract_strided_slice %34 {offsets = [0, 0, 8], sizes = [2, 8, 8], strides = [1, 1, 1]} : vector<2x8x96xf32> to vector<2x8x8xf32>
    %cst_28 = arith.constant 0.353553385 : f32
    %64 = vector.broadcast %cst_28 : f32 to vector<2x8x8xf32>
    %65 = arith.mulf %63, %64 : vector<2x8x8xf32>
    %66 = vector.extract_strided_slice %34 {offsets = [0, 0, 40], sizes = [2, 8, 8], strides = [1, 1, 1]} : vector<2x8x96xf32> to vector<2x8x8xf32>
    %67 = vector.extract_strided_slice %34 {offsets = [0, 0, 72], sizes = [2, 8, 8], strides = [1, 1, 1]} : vector<2x8x96xf32> to vector<2x8x8xf32>
    "tpu.trace_start"() <{level = 10 : i32, message = "bnd,bmd->bnm"}> : () -> ()
    %cst_29 = arith.constant dense<0.000000e+00> : vector<2x8x8xf32>
    %68 = tpu.matmul %65, %66, %cst_29 {dimension_numbers = #tpu.dot_dimension_numbers<[2], [2], [1], [1], [0, 0, 0, 1, 1, 1], [0], [0]>} : vector<2x8x8xf32>, vector<2x8x8xf32>, vector<2x8x8xf32> -> vector<2x8x8xf32>
    "tpu.trace_stop"() : () -> ()
    %cst_30 = arith.constant dense<0xFF800000> : vector<2x8xf32>
    %69 = vector.multi_reduction <maximumf>, %68, %cst_30 [2] : vector<2x8x8xf32> to vector<2x8xf32>
    %70 = vector.shape_cast %69 : vector<2x8xf32> to vector<2x8x1xf32>
    %71 = vector.broadcast %70 : vector<2x8x1xf32> to vector<2x8x8xf32>
    %72 = arith.subf %68, %71 : vector<2x8x8xf32>
    %73 = math.exp %72 : vector<2x8x8xf32>
    %cst_31 = arith.constant dense<0.000000e+00> : vector<2x8xf32>
    %74 = vector.multi_reduction <add>, %73, %cst_31 [2] : vector<2x8x8xf32> to vector<2x8xf32>
    %75 = vector.shape_cast %74 : vector<2x8xf32> to vector<2x8x1xf32>
    %76 = tpu.reciprocal %75 {approx = true} : vector<2x8x1xf32> -> vector<2x8x1xf32>
    %77 = arith.mulf %75, %76 : vector<2x8x1xf32>
    %cst_32 = arith.constant 2.000000e+00 : f32
    %78 = vector.broadcast %cst_32 : f32 to vector<2x8x1xf32>
    %79 = arith.subf %78, %77 : vector<2x8x1xf32>
    %80 = arith.mulf %76, %79 : vector<2x8x1xf32>
    %81 = vector.broadcast %80 : vector<2x8x1xf32> to vector<2x8x8xf32>
    %82 = arith.mulf %73, %81 : vector<2x8x8xf32>
    "tpu.trace_start"() <{level = 10 : i32, message = "bnm,bmd->bnd"}> : () -> ()
    %cst_33 = arith.constant dense<0.000000e+00> : vector<2x8x8xf32>
    %83 = tpu.matmul %82, %67, %cst_33 {dimension_numbers = #tpu.dot_dimension_numbers<[2], [1], [1], [2], [0, 0, 0, 1, 1, 2], [0], [0]>} : vector<2x8x8xf32>, vector<2x8x8xf32>, vector<2x8x8xf32> -> vector<2x8x8xf32>
    "tpu.trace_stop"() : () -> ()
    %84 = vector.shape_cast %83 : vector<2x8x8xf32> to vector<16x8xf32>
    %85 = vector.extract_strided_slice %36 {offsets = [8, 0], sizes = [8, 32], strides = [1, 1]} : vector<32x32xf32> to vector<8x32xf32>
    %cst_34 = arith.constant dense<0.000000e+00> : vector<16x32xf32>
    %86 = tpu.matmul %84, %85, %cst_34 {dimension_numbers = #tpu.dot_dimension_numbers<[1], [0], [0], [1], [0, 0, 1, 1], [], []>} : vector<16x8xf32>, vector<8x32xf32>, vector<16x32xf32> -> vector<16x32xf32>
    %87 = arith.addf %62, %86 : vector<16x32xf32>
    %88 = vector.extract_strided_slice %34 {offsets = [0, 0, 16], sizes = [2, 8, 8], strides = [1, 1, 1]} : vector<2x8x96xf32> to vector<2x8x8xf32>
    %cst_35 = arith.constant 0.353553385 : f32
    %89 = vector.broadcast %cst_35 : f32 to vector<2x8x8xf32>
    %90 = arith.mulf %88, %89 : vector<2x8x8xf32>
    %91 = vector.extract_strided_slice %34 {offsets = [0, 0, 48], sizes = [2, 8, 8], strides = [1, 1, 1]} : vector<2x8x96xf32> to vector<2x8x8xf32>
    %92 = vector.extract_strided_slice %34 {offsets = [0, 0, 80], sizes = [2, 8, 8], strides = [1, 1, 1]} : vector<2x8x96xf32> to vector<2x8x8xf32>
    "tpu.trace_start"() <{level = 10 : i32, message = "bnd,bmd->bnm"}> : () -> ()
    %cst_36 = arith.constant dense<0.000000e+00> : vector<2x8x8xf32>
    %93 = tpu.matmul %90, %91, %cst_36 {dimension_numbers = #tpu.dot_dimension_numbers<[2], [2], [1], [1], [0, 0, 0, 1, 1, 1], [0], [0]>} : vector<2x8x8xf32>, vector<2x8x8xf32>, vector<2x8x8xf32> -> vector<2x8x8xf32>
    "tpu.trace_stop"() : () -> ()
    %cst_37 = arith.constant dense<0xFF800000> : vector<2x8xf32>
    %94 = vector.multi_reduction <maximumf>, %93, %cst_37 [2] : vector<2x8x8xf32> to vector<2x8xf32>
    %95 = vector.shape_cast %94 : vector<2x8xf32> to vector<2x8x1xf32>
    %96 = vector.broadcast %95 : vector<2x8x1xf32> to vector<2x8x8xf32>
    %97 = arith.subf %93, %96 : vector<2x8x8xf32>
    %98 = math.exp %97 : vector<2x8x8xf32>
    %cst_38 = arith.constant dense<0.000000e+00> : vector<2x8xf32>
    %99 = vector.multi_reduction <add>, %98, %cst_38 [2] : vector<2x8x8xf32> to vector<2x8xf32>
    %100 = vector.shape_cast %99 : vector<2x8xf32> to vector<2x8x1xf32>
    %101 = tpu.reciprocal %100 {approx = true} : vector<2x8x1xf32> -> vector<2x8x1xf32>
    %102 = arith.mulf %100, %101 : vector<2x8x1xf32>
    %cst_39 = arith.constant 2.000000e+00 : f32
    %103 = vector.broadcast %cst_39 : f32 to vector<2x8x1xf32>
    %104 = arith.subf %103, %102 : vector<2x8x1xf32>
    %105 = arith.mulf %101, %104 : vector<2x8x1xf32>
    %106 = vector.broadcast %105 : vector<2x8x1xf32> to vector<2x8x8xf32>
    %107 = arith.mulf %98, %106 : vector<2x8x8xf32>
    "tpu.trace_start"() <{level = 10 : i32, message = "bnm,bmd->bnd"}> : () -> ()
    %cst_40 = arith.constant dense<0.000000e+00> : vector<2x8x8xf32>
    %108 = tpu.matmul %107, %92, %cst_40 {dimension_numbers = #tpu.dot_dimension_numbers<[2], [1], [1], [2], [0, 0, 0, 1, 1, 2], [0], [0]>} : vector<2x8x8xf32>, vector<2x8x8xf32>, vector<2x8x8xf32> -> vector<2x8x8xf32>
    "tpu.trace_stop"() : () -> ()
    %109 = vector.shape_cast %108 : vector<2x8x8xf32> to vector<16x8xf32>
    %110 = vector.extract_strided_slice %36 {offsets = [16, 0], sizes = [8, 32], strides = [1, 1]} : vector<32x32xf32> to vector<8x32xf32>
    %cst_41 = arith.constant dense<0.000000e+00> : vector<16x32xf32>
    %111 = tpu.matmul %109, %110, %cst_41 {dimension_numbers = #tpu.dot_dimension_numbers<[1], [0], [0], [1], [0, 0, 1, 1], [], []>} : vector<16x8xf32>, vector<8x32xf32>, vector<16x32xf32> -> vector<16x32xf32>
    %112 = arith.addf %87, %111 : vector<16x32xf32>
    %113 = vector.extract_strided_slice %34 {offsets = [0, 0, 24], sizes = [2, 8, 8], strides = [1, 1, 1]} : vector<2x8x96xf32> to vector<2x8x8xf32>
    %cst_42 = arith.constant 0.353553385 : f32
    %114 = vector.broadcast %cst_42 : f32 to vector<2x8x8xf32>
    %115 = arith.mulf %113, %114 : vector<2x8x8xf32>
    %116 = vector.extract_strided_slice %34 {offsets = [0, 0, 56], sizes = [2, 8, 8], strides = [1, 1, 1]} : vector<2x8x96xf32> to vector<2x8x8xf32>
    %117 = vector.extract_strided_slice %34 {offsets = [0, 0, 88], sizes = [2, 8, 8], strides = [1, 1, 1]} : vector<2x8x96xf32> to vector<2x8x8xf32>
    "tpu.trace_start"() <{level = 10 : i32, message = "bnd,bmd->bnm"}> : () -> ()
    %cst_43 = arith.constant dense<0.000000e+00> : vector<2x8x8xf32>
    %118 = tpu.matmul %115, %116, %cst_43 {dimension_numbers = #tpu.dot_dimension_numbers<[2], [2], [1], [1], [0, 0, 0, 1, 1, 1], [0], [0]>} : vector<2x8x8xf32>, vector<2x8x8xf32>, vector<2x8x8xf32> -> vector<2x8x8xf32>
    "tpu.trace_stop"() : () -> ()
    %cst_44 = arith.constant dense<0xFF800000> : vector<2x8xf32>
    %119 = vector.multi_reduction <maximumf>, %118, %cst_44 [2] : vector<2x8x8xf32> to vector<2x8xf32>
    %120 = vector.shape_cast %119 : vector<2x8xf32> to vector<2x8x1xf32>
    %121 = vector.broadcast %120 : vector<2x8x1xf32> to vector<2x8x8xf32>
    %122 = arith.subf %118, %121 : vector<2x8x8xf32>
    %123 = math.exp %122 : vector<2x8x8xf32>
    %cst_45 = arith.constant dense<0.000000e+00> : vector<2x8xf32>
    %124 = vector.multi_reduction <add>, %123, %cst_45 [2] : vector<2x8x8xf32> to vector<2x8xf32>
    %125 = vector.shape_cast %124 : vector<2x8xf32> to vector<2x8x1xf32>
    %126 = tpu.reciprocal %125 {approx = true} : vector<2x8x1xf32> -> vector<2x8x1xf32>
    %127 = arith.mulf %125, %126 : vector<2x8x1xf32>
    %cst_46 = arith.constant 2.000000e+00 : f32
    %128 = vector.broadcast %cst_46 : f32 to vector<2x8x1xf32>
    %129 = arith.subf %128, %127 : vector<2x8x1xf32>
    %130 = arith.mulf %126, %129 : vector<2x8x1xf32>
    %131 = vector.broadcast %130 : vector<2x8x1xf32> to vector<2x8x8xf32>
    %132 = arith.mulf %123, %131 : vector<2x8x8xf32>
    "tpu.trace_start"() <{level = 10 : i32, message = "bnm,bmd->bnd"}> : () -> ()
    %cst_47 = arith.constant dense<0.000000e+00> : vector<2x8x8xf32>
    %133 = tpu.matmul %132, %117, %cst_47 {dimension_numbers = #tpu.dot_dimension_numbers<[2], [1], [1], [2], [0, 0, 0, 1, 1, 2], [0], [0]>} : vector<2x8x8xf32>, vector<2x8x8xf32>, vector<2x8x8xf32> -> vector<2x8x8xf32>
    "tpu.trace_stop"() : () -> ()
    %134 = vector.shape_cast %133 : vector<2x8x8xf32> to vector<16x8xf32>
    %135 = vector.extract_strided_slice %36 {offsets = [24, 0], sizes = [8, 32], strides = [1, 1]} : vector<32x32xf32> to vector<8x32xf32>
    %cst_48 = arith.constant dense<0.000000e+00> : vector<16x32xf32>
    %136 = tpu.matmul %134, %135, %cst_48 {dimension_numbers = #tpu.dot_dimension_numbers<[1], [0], [0], [1], [0, 0, 1, 1], [], []>} : vector<16x8xf32>, vector<8x32xf32>, vector<16x32xf32> -> vector<16x32xf32>
    %137 = arith.addf %112, %136 : vector<16x32xf32>
    %138 = arith.addf %4, %137 : vector<16x32xf32>
    %c0_49 = arith.constant 0 : index
    %c0_50 = arith.constant 0 : index
    %c0_51 = arith.constant 0 : index
    %139 = vector.load %arg7[%c0_49, %c0_50, %c0_51] : memref<1x1x32xf32, #tpu.memory_space<vmem>>, vector<1x1x32xf32>
    %140 = vector.shape_cast %139 : vector<1x1x32xf32> to vector<1x32xf32>
    %141 = vector.broadcast %140 : vector<1x32xf32> to vector<16x32xf32>
    %142 = arith.addf %138, %141 : vector<16x32xf32>
    %c0_52 = arith.constant 0 : index
    %c0_53 = arith.constant 0 : index
    %c0_54 = arith.constant 0 : index
    %143 = vector.load %arg8[%c0_52, %c0_53, %c0_54] : memref<1x1x32xf32, #tpu.memory_space<vmem>>, vector<1x1x32xf32>
    %144 = vector.shape_cast %143 : vector<1x1x32xf32> to vector<1x32xf32>
    %c0_55 = arith.constant 0 : index
    %c0_56 = arith.constant 0 : index
    %c0_57 = arith.constant 0 : index
    %145 = vector.load %arg9[%c0_55, %c0_56, %c0_57] : memref<1x1x32xf32, #tpu.memory_space<vmem>>, vector<1x1x32xf32>
    %146 = vector.shape_cast %145 : vector<1x1x32xf32> to vector<1x32xf32>
    %cst_58 = arith.constant dense<0.000000e+00> : vector<16xf32>
    %147 = vector.multi_reduction <add>, %142, %cst_58 [1] : vector<16x32xf32> to vector<16xf32>
    %148 = vector.shape_cast %147 : vector<16xf32> to vector<16x1xf32>
    %cst_59 = arith.constant 3.200000e+01 : f32
    %149 = vector.broadcast %cst_59 : f32 to vector<16x1xf32>
    %150 = arith.divf %148, %149 : vector<16x1xf32>
    %151 = vector.broadcast %150 : vector<16x1xf32> to vector<16x32xf32>
    %152 = arith.subf %142, %151 : vector<16x32xf32>
    %153 = arith.mulf %152, %152 : vector<16x32xf32>
    %cst_60 = arith.constant dense<0.000000e+00> : vector<16xf32>
    %154 = vector.multi_reduction <add>, %153, %cst_60 [1] : vector<16x32xf32> to vector<16xf32>
    %155 = vector.shape_cast %154 : vector<16xf32> to vector<16x1xf32>
    %cst_61 = arith.constant 3.200000e+01 : f32
    %156 = vector.broadcast %cst_61 : f32 to vector<16x1xf32>
    %157 = arith.divf %155, %156 : vector<16x1xf32>
    %158 = vector.broadcast %150 : vector<16x1xf32> to vector<16x32xf32>
    %159 = arith.subf %142, %158 : vector<16x32xf32>
    %cst_62 = arith.constant 9.99999974E-6 : f32
    %160 = vector.broadcast %cst_62 : f32 to vector<16x1xf32>
    %161 = arith.addf %157, %160 : vector<16x1xf32>
    %162 = math.rsqrt %161 : vector<16x1xf32>
    %163 = vector.broadcast %162 : vector<16x1xf32> to vector<16x32xf32>
    %164 = arith.mulf %159, %163 : vector<16x32xf32>
    %165 = vector.broadcast %144 : vector<1x32xf32> to vector<16x32xf32>
    %166 = arith.mulf %164, %165 : vector<16x32xf32>
    %167 = vector.broadcast %146 : vector<1x32xf32> to vector<16x32xf32>
    %168 = arith.addf %166, %167 : vector<16x32xf32>
    %c0_63 = arith.constant 0 : index
    %c0_64 = arith.constant 0 : index
    %c0_65 = arith.constant 0 : index
    %169 = vector.load %arg10[%c0_63, %c0_64, %c0_65] : memref<1x32x64xf32, #tpu.memory_space<vmem>>, vector<1x32x64xf32>
    %170 = vector.shape_cast %169 : vector<1x32x64xf32> to vector<32x64xf32>
    %cst_66 = arith.constant dense<0.000000e+00> : vector<16x64xf32>
    %171 = tpu.matmul %168, %170, %cst_66 {dimension_numbers = #tpu.dot_dimension_numbers<[1], [0], [0], [1], [0, 0, 1, 1], [], []>} : vector<16x32xf32>, vector<32x64xf32>, vector<16x64xf32> -> vector<16x64xf32>
    %c0_67 = arith.constant 0 : index
    %c0_68 = arith.constant 0 : index
    %c0_69 = arith.constant 0 : index
    %172 = vector.load %arg11[%c0_67, %c0_68, %c0_69] : memref<1x1x64xf32, #tpu.memory_space<vmem>>, vector<1x1x64xf32>
    %173 = vector.shape_cast %172 : vector<1x1x64xf32> to vector<1x64xf32>
    %174 = vector.broadcast %173 : vector<1x64xf32> to vector<16x64xf32>
    %175 = arith.addf %171, %174 : vector<16x64xf32>
    %cst_70 = arith.constant 5.000000e-01 : f32
    %176 = vector.broadcast %cst_70 : f32 to vector<16x64xf32>
    %177 = arith.mulf %176, %175 : vector<16x64xf32>
    %cst_71 = arith.constant 0.707106769 : f32
    %178 = vector.broadcast %cst_71 : f32 to vector<16x64xf32>
    %179 = arith.mulf %175, %178 : vector<16x64xf32>
    %cst_72 = arith.constant 0.000000e+00 : f32
    %180 = vector.broadcast %cst_72 : f32 to vector<16x64xf32>
    %181 = arith.cmpf olt, %179, %180 : vector<16x64xf32>
    %cst_73 = arith.constant -1.000000e+00 : f32
    %cst_74 = arith.constant 1.000000e+00 : f32
    %182 = vector.broadcast %cst_73 : f32 to vector<16x64xf32>
    %183 = vector.broadcast %cst_74 : f32 to vector<16x64xf32>
    %184 = arith.select %181, %182, %183 : vector<16x64xi1>, vector<16x64xf32>
    %185 = math.absf %179 : vector<16x64xf32>
    %cst_75 = arith.constant 0.327591091 : f32
    %186 = vector.broadcast %cst_75 : f32 to vector<16x64xf32>
    %187 = arith.mulf %186, %185 : vector<16x64xf32>
    %cst_76 = arith.constant 1.000000e+00 : f32
    %188 = vector.broadcast %cst_76 : f32 to vector<16x64xf32>
    %189 = arith.addf %188, %187 : vector<16x64xf32>
    %190 = tpu.reciprocal %189 {approx = true} : vector<16x64xf32> -> vector<16x64xf32>
    %191 = arith.mulf %189, %190 : vector<16x64xf32>
    %cst_77 = arith.constant 2.000000e+00 : f32
    %192 = vector.broadcast %cst_77 : f32 to vector<16x64xf32>
    %193 = arith.subf %192, %191 : vector<16x64xf32>
    %194 = arith.mulf %190, %193 : vector<16x64xf32>
    %cst_78 = arith.constant 1.06140542 : f32
    %195 = vector.broadcast %cst_78 : f32 to vector<16x64xf32>
    %196 = arith.mulf %195, %194 : vector<16x64xf32>
    %cst_79 = arith.constant -1.45315206 : f32
    %197 = vector.broadcast %cst_79 : f32 to vector<16x64xf32>
    %198 = arith.addf %196, %197 : vector<16x64xf32>
    %199 = arith.mulf %198, %194 : vector<16x64xf32>
    %cst_80 = arith.constant 1.42141378 : f32
    %200 = vector.broadcast %cst_80 : f32 to vector<16x64xf32>
    %201 = arith.addf %199, %200 : vector<16x64xf32>
    %202 = arith.mulf %201, %194 : vector<16x64xf32>
    %cst_81 = arith.constant -0.284496725 : f32
    %203 = vector.broadcast %cst_81 : f32 to vector<16x64xf32>
    %204 = arith.addf %202, %203 : vector<16x64xf32>
    %205 = arith.mulf %204, %194 : vector<16x64xf32>
    %cst_82 = arith.constant 0.254829586 : f32
    %206 = vector.broadcast %cst_82 : f32 to vector<16x64xf32>
    %207 = arith.addf %205, %206 : vector<16x64xf32>
    %208 = arith.mulf %207, %194 : vector<16x64xf32>
    %cst_83 = arith.constant 0.000000e+00 : f32
    %209 = vector.broadcast %cst_83 : f32 to vector<16x64xf32>
    %210 = arith.subf %209, %185 : vector<16x64xf32>
    %211 = arith.mulf %210, %185 : vector<16x64xf32>
    %212 = math.exp %211 : vector<16x64xf32>
    %213 = arith.mulf %208, %212 : vector<16x64xf32>
    %cst_84 = arith.constant 1.000000e+00 : f32
    %214 = vector.broadcast %cst_84 : f32 to vector<16x64xf32>
    %215 = arith.subf %214, %213 : vector<16x64xf32>
    %216 = arith.mulf %184, %215 : vector<16x64xf32>
    %cst_85 = arith.constant 1.000000e+00 : f32
    %217 = vector.broadcast %cst_85 : f32 to vector<16x64xf32>
    %218 = arith.addf %217, %216 : vector<16x64xf32>
    %219 = arith.mulf %177, %218 : vector<16x64xf32>
    %c0_86 = arith.constant 0 : index
    %c0_87 = arith.constant 0 : index
    %c0_88 = arith.constant 0 : index
    %220 = vector.load %arg12[%c0_86, %c0_87, %c0_88] : memref<1x64x32xf32, #tpu.memory_space<vmem>>, vector<1x64x32xf32>
    %221 = vector.shape_cast %220 : vector<1x64x32xf32> to vector<64x32xf32>
    %cst_89 = arith.constant dense<0.000000e+00> : vector<16x32xf32>
    %222 = tpu.matmul %219, %221, %cst_89 {dimension_numbers = #tpu.dot_dimension_numbers<[1], [0], [0], [1], [0, 0, 1, 1], [], []>} : vector<16x64xf32>, vector<64x32xf32>, vector<16x32xf32> -> vector<16x32xf32>
    %c0_90 = arith.constant 0 : index
    %c0_91 = arith.constant 0 : index
    %c0_92 = arith.constant 0 : index
    %223 = vector.load %arg13[%c0_90, %c0_91, %c0_92] : memref<1x1x32xf32, #tpu.memory_space<vmem>>, vector<1x1x32xf32>
    %224 = vector.shape_cast %223 : vector<1x1x32xf32> to vector<1x32xf32>
    %225 = vector.broadcast %224 : vector<1x32xf32> to vector<16x32xf32>
    %226 = arith.addf %222, %225 : vector<16x32xf32>
    %227 = arith.addf %142, %226 : vector<16x32xf32>
    %228 = vector.shape_cast %227 : vector<16x32xf32> to vector<2x8x32xf32>
    %c0_93 = arith.constant 0 : index
    %c0_94 = arith.constant 0 : index
    %c0_95 = arith.constant 0 : index
    %229 = vector.load %arg14[%c0_93, %c0_94, %c0_95] : memref<2x8x32xf32, #tpu.memory_space<vmem>>, vector<2x8x32xf32>
    tpu.vector_store %arg14[%c0_93, %c0_94, %c0_95], %228 {strides = array<i32>} : memref<2x8x32xf32, #tpu.memory_space<vmem>>, vector<2x8x32xf32>,
    return
  }
  func.func @transform_0(%arg0: i32, %arg1: i32) -> (i32, i32, i32) {
    %c0_i32 = arith.constant 0 : i32
    %c0_i32_0 = arith.constant 0 : i32
    %c0_i32_1 = arith.constant 0 : i32
    return %arg0, %c0_i32, %c0_i32_0 : i32, i32, i32
  }
  func.func @transform_1(%arg0: i32, %arg1: i32) -> (i32, i32, i32) {
    %c0_i32 = arith.constant 0 : i32
    %c0_i32_0 = arith.constant 0 : i32
    %c0_i32_1 = arith.constant 0 : i32
    return %arg1, %c0_i32, %c0_i32_0 : i32, i32, i32
  }
  func.func @transform_2(%arg0: i32, %arg1: i32) -> (i32, i32, i32) {
    %c0_i32 = arith.constant 0 : i32
    %c0_i32_0 = arith.constant 0 : i32
    %c0_i32_1 = arith.constant 0 : i32
    return %arg1, %c0_i32, %c0_i32_0 : i32, i32, i32
  }
  func.func @transform_3(%arg0: i32, %arg1: i32) -> (i32, i32, i32) {
    %c0_i32 = arith.constant 0 : i32
    %c0_i32_0 = arith.constant 0 : i32
    %c0_i32_1 = arith.constant 0 : i32
    return %arg1, %c0_i32, %c0_i32_0 : i32, i32, i32
  }
  func.func @transform_4(%arg0: i32, %arg1: i32) -> (i32, i32, i32) {
    %c0_i32 = arith.constant 0 : i32
    %c0_i32_0 = arith.constant 0 : i32
    %c0_i32_1 = arith.constant 0 : i32
    return %arg1, %c0_i32, %c0_i32_0 : i32, i32, i32
  }
  func.func @transform_5(%arg0: i32, %arg1: i32) -> (i32, i32, i32) {
    %c0_i32 = arith.constant 0 : i32
    %c0_i32_0 = arith.constant 0 : i32
    %c0_i32_1 = arith.constant 0 : i32
    return %arg1, %c0_i32, %c0_i32_0 : i32, i32, i32
  }
  func.func @transform_6(%arg0: i32, %arg1: i32) -> (i32, i32, i32) {
    %c0_i32 = arith.constant 0 : i32
    %c0_i32_0 = arith.constant 0 : i32
    %c0_i32_1 = arith.constant 0 : i32
    return %arg1, %c0_i32, %c0_i32_0 : i32, i32, i32
  }
  func.func @transform_7(%arg0: i32, %arg1: i32) -> (i32, i32, i32) {
    %c0_i32 = arith.constant 0 : i32
    %c0_i32_0 = arith.constant 0 : i32
    %c0_i32_1 = arith.constant 0 : i32
    return %arg1, %c0_i32, %c0_i32_0 : i32, i32, i32
  }
  func.func @transform_8(%arg0: i32, %arg1: i32) -> (i32, i32, i32) {
    %c0_i32 = arith.constant 0 : i32
    %c0_i32_0 = arith.constant 0 : i32
    %c0_i32_1 = arith.constant 0 : i32
    return %arg1, %c0_i32, %c0_i32_0 : i32, i32, i32
  }
  func.func @transform_9(%arg0: i32, %arg1: i32) -> (i32, i32, i32) {
    %c0_i32 = arith.constant 0 : i32
    %c0_i32_0 = arith.constant 0 : i32
    %c0_i32_1 = arith.constant 0 : i32
    return %arg1, %c0_i32, %c0_i32_0 : i32, i32, i32
  }
  func.func @transform_10(%arg0: i32, %arg1: i32) -> (i32, i32, i32) {
    %c0_i32 = arith.constant 0 : i32
    %c0_i32_0 = arith.constant 0 : i32
    %c0_i32_1 = arith.constant 0 : i32
    return %arg1, %c0_i32, %c0_i32_0 : i32, i32, i32
  }
  func.func @transform_11(%arg0: i32, %arg1: i32) -> (i32, i32, i32) {
    %c0_i32 = arith.constant 0 : i32
    %c0_i32_0 = arith.constant 0 : i32
    %c0_i32_1 = arith.constant 0 : i32
    return %arg1, %c0_i32, %c0_i32_0 : i32, i32, i32
  }
  func.func @transform_12(%arg0: i32, %arg1: i32) -> (i32, i32, i32) {
    %c0_i32 = arith.constant 0 : i32
    %c0_i32_0 = arith.constant 0 : i32
    %c0_i32_1 = arith.constant 0 : i32
    return %arg0, %c0_i32, %c0_i32_0 : i32, i32, i32
  }
}

</mosaic_0001>

<bundles_post_ra>
// kernel: tpu_custom_call.1
= control target key start
LH: loop header
LB: loop body
LE: loop exit
PB: predicated region body
PF: predicated region fallthrough
CT: control target
= control target key end

     0   :  { %s3878_s0 = inlined_call_operand.hbm [shape: f32[2,8,32], index: 0, kind: input, shape index: {}]   ;;  %s3879_s1 = inlined_call_operand.vmem [shape: f32[2,1,32], index: 1, kind: input, shape index: {}]   ;;  %s3880_s2 = inlined_call_operand.vmem [shape: f32[2,1,32], index: 2, kind: input, shape index: {}]   ;;  %s3881_s3 = inlined_call_operand.vmem [shape: f32[2,32,96], index: 3, kind: input, shape index: {}]   ;;  %s3882_s4 = inlined_call_operand.vmem [shape: f32[2,32,32], index: 4, kind: input, shape index: {}]   ;;  %s3883_s5 = inlined_call_operand.vmem [shape: f32[2,1,32], index: 5, kind: input, shape index: {}]   ;;  %s3884_s6 = inlined_call_operand.vmem [shape: f32[2,1,32], index: 6, kind: input, shape index: {}]   ;;  %s3885_s7 = inlined_call_operand.vmem [shape: f32[2,1,32], index: 7, kind: input, shape index: {}]   ;;  %s3886_s8 = inlined_call_operand.vmem [shape: f32[2,32,64], index: 8, kind: input, shape index: {}]   ;;  %s3887_s9 = inlined_call_operand.vmem [shape: f32[2,1,64], index: 9, kind: input, shape index: {}]   ;;  %s3888_s10 = inlined_call_operand.vmem [shape: f32[2,64,32], index: 10, kind: input, shape index: {}]   ;;  %s3889_s11 = inlined_call_operand.vmem [shape: f32[2,1,32], index: 11, kind: input, shape index: {}]   ;;  %s3890_s12 = inlined_call_operand.hbm [shape: f32[2,8,32], index: 12, kind: output, shape index: {}]  }
   0x1   :  { %3897 = sst [smem:[#allocation10_spill]] %s3878_s0 }
   0x2   :  { %3898 = sst [smem:[#allocation11_spill]] %s3881_s3 }
   0x3   :  { %3899 = sst [smem:[#allocation12_spill]] %s3882_s4 }
   0x4   :  { %3900 = sst [smem:[#allocation13_spill]] %s3890_s12 }
   0x5   :  { %17 = vsyncpa [#allocation3], 0 }
   0x6   :  { %18 = vsyncpa [#allocation4], 0  ;;  %s3494_s21 = smov 0   ;;  %s3496_s22 = smov 0  }
   0x7   :  { %s3498_s23 = smov 0  }
   0x8 LB: > { %3901 = sst [smem:[#allocation8_spill]] %s3403_s22  ;;  %s3894_s24 = sadd.s32 4294967295, %s3407_s23   ;;  %s3407_s23 = sphi %s3498_s23, %s24_s23   ;;  %s3403_s22 = sphi %s3496_s22, %s3920_s22   ;;  %s3399_s21 = sphi %s3494_s21, %s3919_s21  }
   0x9   : > { %s33_s25 = sadd.s32 1, %s3403_s22  ;;  %p2903_p1 = scmp.ge.s32.totalorder %s3407_s23, 1 }
   0xa   : > { %p34_p0 = scmp.ge.s32.totalorder %s33_s25, 2  ;;  %p379_p2 = scmp.lt.s32.totalorder %s3407_s23, 3 }
   0xb   : > { %p3521_p4 = scmp.eq.s32.totalorder %s3894_s24, 0  ;;  %s3409_s28 = smov [#allocation2]  }
   0xc   : > { %s3922_s25 = smov (%p34_p0, %s33_s25), 0  ;;  %p3515_p3 = pnand %p2903_p1, %p379_p2 }
   0xd   : > { %3902 = sst [smem:[#allocation9_spill]] %s3922_s25  ;;  %s394_s29 = sshll.u32 %s3409_s28, 4  ;;  %s395_s29 = int_to_ptr.vmem [resolvable:$true] %s394_s29 }
   0xe   : > { %s3903_s26 = scalar_select %p3515_p3, 1, 0 }
   0xf   : > { %s3904_s27 = scalar_select %p3521_p4, 1, 0 }
  0x10   : > { %p3223_p5 = pneg %p3515_p3  ;;  %s3906_s0 = sld [smem:[#allocation10_spill]] }
  0x12   : > { %p3529_p6 = pnand %p3521_p4, %p3223_p5 }
  0x14   : > { %p3325_p8 = pneg %p3529_p6 }
  0x16   : > { %s3323_s15 = scalar_lea.hbm %s3906_s0, 256 }
  0x17   : > { %p3324_p7 = scmp.ne.s32.totalorder %s3906_s0, %s3323_s15  ;;  %p3330_p11 = scmp.lt.u32.totalorder %s3323_s15, %s3906_s0 }
  0x19   : > { %p3326_p9 = pnand %p3325_p8, %p3324_p7 }
  0x1b   : > { %p3327_p10 = pneg %p3326_p9 }
  0x1d   : > { %p3332_p12 = pnand %p3330_p11, %p3327_p10 }
  0x1f   : > { %3335 = shalt.err (!%p3332_p12)
}
  0x20   : > { %s3336_s20 = scalar_lea.vmem %s395_s29, 256  ;;  %p3344_p2 = scmp.lt.s32.totalorder %s395_s29, %s395_s29 }
  0x21   : > { %p3337_p13 = scmp.ne.s32.totalorder %s395_s29, %s3336_s20  ;;  %p3345_p5 = scmp.lt.s32.totalorder %s3336_s20, %s3336_s20 }
  0x23   : > { %p3339_p0 = pnand %p3337_p13, %p3325_p8  ;;  %p3346_p4 = por %p3345_p5, %p3344_p2 }
  0x25   : > { %p3340_p1 = pneg %p3339_p0 }
  0x27   : > { %p3347_p3 = pnand %p3346_p4, %p3340_p1 }
  0x29   : > { %3350 = shalt.err (!%p3347_p3)
}
  0x2a   : > { %s3410_s28 = smov 128   ;;  %s3411_s13 = smov 8  }
  0x2b   : > { %3226 = dma.hbm_to_vmem [thread:$0]  (!%p3529_p6), %s3906_s0, 256, %s395_s29, [#allocation3], %s3410_s28, %s3410_s28, %s3411_s13  }
  0x2c   : > { %p3907_p7 = scmp.ne.s32.totalorder %s3903_s26, 0 }
  0x2d   : > { %p3908_p9 = scmp.ne.s32.totalorder (!%p3907_p7), %s3904_s27, 0 }
  0x2e   : > { %484 = sbr.rel (%p3907_p7) target bundleno = 4325 (0x10e5), region = 68 }
  0x35   : > { %3390 = dma.done.wait (%p3908_p9), [#allocation3], 256  }
  0x36   : > { %3392 = vsyncadd (%p3908_p9), [#allocation3], 4294967040  ;;  %p558_p3 = scmp.lt.s32.totalorder %s3399_s21, 1  ;;  %s3909_s3 = sld [smem:[#allocation11_spill]] }
  0x37   : > { %s3910_s4 = sld [smem:[#allocation12_spill]]  ;;  %p2916_p4 = scmp.ne.s32.totalorder %s3399_s21, 0 }
  0x38   : > { %s3557_s15 = scalar_select %p558_p3, %s3399_s21, 1 }
  0x39   : > { %603 = sbr.rel (%p2916_p4) target bundleno = 64 (0x40), region = 76  ;;  %v604_v0 = vld [vmem:[#allocation2] sm:$0xff] (!%p2916_p4)  ;;  %vm606_vm0 = vcmask (!%p2916_p4), 261120   ;;  %v605_v1 = vld [vmem:[#allocation2 + $0x8] sm:$0xff] (!%p2916_p4) }
  0x3a   : > { %s2966_s19 = sshll.u32 %s3557_s15, 5  ;;  %s582_s22 = scalar_lea.vmem %s3885_s7, %s3557_s15  ;;  %607 = vst.msk [vmem:[#allocation5] sm:$0xff] (!%p2916_p4), %vm606_vm0, %v604_v0  ;;  %608 = vst.msk [vmem:[#allocation5 + $0x8] sm:$0xff] (!%p2916_p4), %vm606_vm0, %v605_v1 }
  0x3b   : > { %s3593_s13 = scalar_lea.vmem %s3886_s8, %s2966_s19  ;;  %s2969_s24 = sshll.u32 %s3557_s15, 6 }
  0x3c   : > { %s3575_s30 = scalar_lea.vmem %s3909_s3, %s2966_s19  ;;  %s590_s3 = scalar_lea.vmem %s3887_s9, %s3557_s15 }
  0x3d   : > { %s3580_s0 = scalar_lea.vmem %s3910_s4, %s2966_s19  ;;  %s598_s12 = scalar_lea.vmem %s3889_s11, %s3557_s15 }
  0x3e   : > { %s3607_s27 = scalar_lea.vmem %s3888_s10, %s2969_s24 }
  0x40 PF: > { %vm613_vm1 = vcmask 261120   ;;  %v657_v16 = vld [vmem:[%s3575_s30] sm:$0xff]  ;;  %v658_v17 = vld [vmem:[%s3575_s30 + $0x8] sm:$0xff]  ;;  %v659_v18 = vld [vmem:[%s3575_s30 + $0x10] sm:$0xff]  ;;  %s3911_s18 = scalar_lea.vmem %s3879_s1, %s3557_s15  ;;  %s3912_s29 = scalar_lea.vmem %s3880_s2, %s3557_s15  ;;  %v3412_v38 = vmov 0.0   ;;  %vm3413_vm2 = vmmov 0  }
  0x41   : > { %v3610_v2 = vld [vmem:[#allocation5] sm:$0xff]  ;;  %v3612_v3 = vld [vmem:[#allocation5 + $0x8] sm:$0xff]  ;;  %v3177_v19 = vpack.c.bf16 %v658_v17, %v657_v16  ;;  %v2917_v29 = vld [vmem:[%s3911_s18] ss:$0 sm:$0xff]  ;;  %3057 = vmatprep.subr.mxu0 %v3412_v38  ;;  %3059 = vmatprep.mubr.msk.f32.mxu0 %vm3413_vm2, %v3412_v38  ;;  %s3414_s20 = smov 96   ;;  %vm751_vm3 = vcmask 64512  }
  0x42   : > { %v614_v4 = vsel %vm613_vm1, %v3610_v2, 0.0  ;;  %v617_v5 = vsel %vm613_vm1, %v3612_v3, 0.0  ;;  %v660_v20 = vld [vmem:[%s3575_s30 + $0x18] sm:$0xff]  ;;  %v2918_v31 = vld [vmem:[%s3912_s29] ss:$0 sm:$0xff]  ;;  %s3415_s28 = smov 88   ;;  %s3913_s29 = scalar_lea.vmem %s3883_s5, %s3557_s15 }
  0x43   : > { %615 = vadd.xlane.f32.xlu0 %v614_v4  ;;  %v3181_v21 = vpack.c.bf16 %v660_v20, %v659_v18  ;;  %3178 = vmatprep.subr.bf16.mxu1 %v3177_v19  ;;  %s3416_s14 = smov 120   ;;  %s3417_s16 = smov 64   ;;  %vm2641_vm6 = vcmask 523264  }
  0x44   : > { %3180 = vmatpush3.bf16.msra.mxu1 %v3177_v19  ;;  %s3418_s24 = smov 56   ;;  %s3419_s17 = smov 112  }
  0x45   : > { %3182 = vmatprep.subr.bf16.mxu1 %v3181_v21  ;;  %s3420_s25 = smov 80   ;;  %s3421_s26 = smov 48  }
  0x46   : > { %s3422_s4 = smov 72   ;;  %s3423_s21 = smov 104  }
  0x47   : > { %618 = vadd.xlane.f32.xlu0 %v617_v5  ;;  %s3424_s18 = smov 40  }
  0x48   : > { %3184 = vmatpush3.bf16.msra.mxu1 %v3181_v21 }
  0x49   : > { %3047 = vmatprep.subr.mxu1 %v3412_v38 }
  0xd0   : > { %v616_v6 = vpop.xlane.xlu0 %615 }
  0xd1   : > { %v621_v7 = vmul.f32 0.03125, %v616_v6 }
  0xd3   : > { %v623_v8 = vsub.f32 %v3610_v2, %v621_v7 }
  0xd4   : > { %v619_v9 = vpop.xlane.xlu0 %618 }
  0xd5   : > { %v622_v10 = vmul.f32 0.03125, %v619_v9  ;;  %v625_v11 = vmul.f32 %v623_v8, %v623_v8 }
  0xd7   : > { %v624_v12 = vsub.f32 %v3612_v3, %v622_v10  ;;  %v627_v13 = vsel %vm613_vm1, %v625_v11, 0.0 }
  0xd8   : > { %628 = vadd.xlane.f32.xlu1 %v627_v13 }
  0xd9   : > { %v626_v14 = vmul.f32 %v624_v12, %v624_v12 }
  0xdb   : > { %v630_v15 = vsel %vm613_vm1, %v626_v14, 0.0 }
  0xdc   : > { %631 = vadd.xlane.f32.xlu1 %v630_v15 }
 0x165   : > { %v629_v22 = vpop.xlane.xlu1 %628 }
 0x166   : > { %v633_v23 = vmul.f32 0.03125, %v629_v22 }
 0x168   : > { %v635_v24 = vadd.f32 1e-05, %v633_v23 }
 0x169   : > { %v632_v25 = vpop.xlane.xlu1 %631 }
 0x16a   : > { %3275 = vrsqrt.f32 %v635_v24  ;;  %v634_v26 = vmul.f32 0.03125, %v632_v25 }
 0x16c   : > { %v636_v27 = vadd.f32 1e-05, %v634_v26 }
 0x16e   : > { %3277 = vrsqrt.f32 %v636_v27 }
 0x174   : > { %v3276_v28 = vpop.eup %3275 }
 0x175   : > { %v639_v30 = vmul.f32 %v3276_v28, %v623_v8 }
 0x177   : > { %v647_v32 = vmul.f32 %v2917_v29, %v639_v30 }
 0x178   : > { %v3278_v33 = vpop.eup %3277 }
 0x179   : > { %v640_v34 = vmul.f32 %v3278_v33, %v624_v12  ;;  %v655_v35 = vadd.f32 %v2918_v31, %v647_v32 }
 0x17b   : > { %v648_v36 = vmul.f32 %v2917_v29, %v640_v34  ;;  %3044 = vmatprep.mubr.msk.f32.mxu1 %vm613_vm1, %v655_v35 }
 0x17d   : > { %v656_v37 = vadd.f32 %v2918_v31, %v648_v36 }
 0x17f   : > { %3045 = vmatmul.mubr.msk.f32.vlgmr.msra.gmra.mrb[0].mxu1 %vm613_vm1, %v656_v37 }
 0x180   : > { %3049 = vmatprep.mubr.msk.f32.mxu1 %vm3413_vm2, %v3412_v38 }
 0x252   : > { %v3644_v39 = vpop.f32.mrb[0].mxu1 }
 0x253   : > { %828 = vrot.lane.b32.xlu1 %v3644_v39, %s3414_s20  ;;  %v3647_v40 = vpop.f32.mrb[1].mxu1  ;;  %v3661_v44 = vmul.f32 0.35355338, %v3644_v39 }
 0x254   : > { %749 = vrot.lane.b32.xlu0 %v3647_v40, %s3414_s20  ;;  %v3652_v42 = vmul.f32 0.35355338, %v3647_v40 }
 0x2c5   : > { %v829_v43 = vpop.permute.xlu1 %828 }
 0x2c6   : > { %v750_v41 = vpop.permute.xlu0 %749 }
 0x2c7   : > { %3048 = vmatpush3.xpose.msk.msra.mxu1 %vm751_vm3, %v750_v41 }
 0x2c8   : > { %3052 = vmatprep.subr.mxu1 %v3412_v38 }
 0x2ca   : > { %3050 = vmatmul.mubr.msk.f32.vlgmr.msra.gmra.mrb[2].mxu1 %vm751_vm3, %v3652_v42 }
 0x2cb   : > { %3053 = vmatpush3.xpose.msk.msra.mxu1 %vm751_vm3, %v829_v43  ;;  %3054 = vmatprep.mubr.msk.f32.mxu1 %vm3413_vm2, %v3412_v38 }
 0x2cc   : > { %3062 = vmatprep.subr.mxu1 %v3412_v38 }
 0x2ce   : > { %3055 = vmatmul.mubr.msk.f32.vlgmr.msra.gmra.mrb[4].mxu1 %vm751_vm3, %v3661_v44 }
 0x2cf   : > { %3064 = vmatprep.mubr.msk.f32.mxu1 %vm3413_vm2, %v3412_v38 }
 0x39d   : > { %v823_v45 = vpop.f32.mrb[2].mxu1 }
 0x39e   : > { %v3051_v46 = vpop.f32.mrb[3].mxu1  ;;  %v905_v50 = vsel %vm751_vm3, %v823_v45, -inf }
 0x3a1   : > { %v901_v47 = vpop.f32.mrb[4].mxu1 }
 0x3a2   : > { %v3056_v48 = vpop.f32.mrb[5].mxu1  ;;  %v908_v49 = vsel %vm751_vm3, %v901_v47, -inf }
 0x3a3   : > { %909 = vmax.xlane.f32.xlu1 %v908_v49 }
 0x3b4   : > { %1165 = vrot.lane.b32.xlu1 %v3644_v39, %s3415_s28 }
 0x3b8   : > { %1163 = vrot.lane.b32.xlu1 %v3661_v44, %s3416_s14 }
 0x3dc   : > { %906 = vmax.xlane.f32.xlu1 %v905_v50 }
 0x3ed   : > { %1087 = vrot.lane.b32.xlu1 %v3647_v40, %s3415_s28 }
 0x3f1   : > { %1085 = vrot.lane.b32.xlu1 %v3652_v42, %s3416_s14 }
 0x430   : > { %v910_v51 = vpop.xlane.xlu1 %909 }
 0x431   : > { %v912_v52 = vsub.f32 %v901_v47, %v910_v51 }
 0x433   : > { %v915_v53 = vmul.f32 1.442695, %v912_v52 }
 0x434   : > { %v1166_v56 = vpop.permute.xlu1 %1165 }
 0x435   : > { %3279 = vpow2.f32 %v915_v53 }
 0x438   : > { %v1164_v57 = vpop.permute.xlu1 %1163 }
 0x43f   : > { %v3280_v54 = vpop.eup %3279 }
 0x440   : > { %v920_v55 = vsel %vm751_vm3, %v3280_v54, 0.0 }
 0x441   : > { %921 = vadd.xlane.f32.xlu0 %v920_v55 }
 0x457   : > { %1009 = vrot.lane.b32.xlu0 %v3644_v39, %s3417_s16 }
 0x469   : > { %v907_v58 = vpop.xlane.xlu1 %906 }
 0x46a   : > { %v911_v59 = vsub.f32 %v823_v45, %v907_v58 }
 0x46c   : > { %v913_v60 = vmul.f32 1.442695, %v911_v59 }
 0x46d   : > { %v1088_v14 = vpop.permute.xlu1 %1087 }
 0x46e   : > { %3281 = vpow2.f32 %v913_v60 }
 0x471   : > { %v1086_v16 = vpop.permute.xlu1 %1085 }
 0x478   : > { %v3282_v61 = vpop.eup %3281 }
 0x479   : > { %v917_v62 = vsel %vm751_vm3, %v3282_v61, 0.0 }
 0x47a   : > { %918 = vadd.xlane.f32.xlu0 %v917_v62 }
 0x490   : > { %933 = vrot.lane.b32.xlu0 %v3647_v40, %s3417_s16 }
 0x4ce   : > { %v922_v63 = vpop.xlane.xlu0 %921 }
 0x4cf   : > { %3283 = vrcp.f32 %v922_v63 }
 0x4d2   : > { %v1010_v0 = vpop.permute.xlu0 %1009 }
 0x4d3   : > { %3063 = vmatpush3.msra.mxu1 %v1010_v0 }
 0x4d4   : > { %3072 = vmatprep.subr.mxu1 %v3412_v38 }
 0x4d9   : > { %v3284_v1 = vpop.eup %3283 }
 0x4da   : > { %v926_v4 = vmul.f32 %v3284_v1, %v922_v63 }
 0x4dc   : > { %v928_v5 = vsub.f32 2.0, %v926_v4 }
 0x4de   : > { %v930_v6 = vmul.f32 %v3284_v1, %v928_v5 }
 0x4e0   : > { %v932_v7 = vmul.f32 %v3280_v54, %v930_v6  ;;  %v743_v6 = vld [vmem:[%s3580_s0 + $0x8] sm:$0xff] }
 0x4e2   : > { %3065 = vmatmul.mubr.msk.f32.vlgmr.msra.gmra.mrb[6].mxu1 %vm751_vm3, %v932_v7  ;;  %v742_v7 = vld [vmem:[%s3580_s0] sm:$0xff] }
 0x4e3   : > { %3073 = vmatpush3.xpose.msk.msra.mxu1 %vm751_vm3, %v1166_v56  ;;  %3074 = vmatprep.mubr.msk.f32.mxu1 %vm3413_vm2, %v3412_v38 }
 0x4e4   : > { %3082 = vmatprep.subr.mxu1 %v3412_v38 }
 0x4e6   : > { %3075 = vmatmul.mubr.msk.f32.vlgmr.msra.gmra.mrb[8].mxu1 %vm751_vm3, %v1164_v57 }
 0x4e7   : > { %3084 = vmatprep.mubr.msk.f32.mxu1 %vm3413_vm2, %v3412_v38 }
 0x507   : > { %v919_v8 = vpop.xlane.xlu0 %918 }
 0x508   : > { %3285 = vrcp.f32 %v919_v8 }
 0x50b   : > { %v934_v9 = vpop.permute.xlu0 %933 }
 0x50c   : > { %3058 = vmatpush3.msra.mxu0 %v934_v9 }
 0x50d   : > { %3067 = vmatprep.subr.mxu0 %v3412_v38 }
 0x512   : > { %v3286_v10 = vpop.eup %3285 }
 0x513   : > { %v925_v11 = vmul.f32 %v3286_v10, %v919_v8 }
 0x515   : > { %v927_v12 = vsub.f32 2.0, %v925_v11 }
 0x517   : > { %v929_v13 = vmul.f32 %v3286_v10, %v927_v12 }
 0x519   : > { %v931_v15 = vmul.f32 %v3282_v61, %v929_v13 }
 0x51b   : > { %3060 = vmatmul.mubr.msk.f32.vlgmr.msra.gmra.mrb[0].mxu0 %vm751_vm3, %v931_v15 }
 0x51c   : > { %3068 = vmatpush3.xpose.msk.msra.mxu0 %vm751_vm3, %v1088_v14  ;;  %3069 = vmatprep.mubr.msk.f32.mxu0 %vm3413_vm2, %v3412_v38 }
 0x51d   : > { %3077 = vmatprep.subr.mxu0 %v3412_v38 }
 0x51f   : > { %3070 = vmatmul.mubr.msk.f32.vlgmr.msra.gmra.mrb[2].mxu0 %vm751_vm3, %v1086_v16 }
 0x520   : > { %3079 = vmatprep.mubr.msk.f32.mxu0 %vm3413_vm2, %v3412_v38 }
 0x5b5   : > { %v3696_v17 = vpop.f32.mrb[6].mxu1 }
 0x5b6   : > { %v3066_v18 = vpop.f32.mrb[7].mxu1 }
 0x5b9   : > { %v1237_v19 = vpop.f32.mrb[8].mxu1 }
 0x5ba   : > { %v3076_v20 = vpop.f32.mrb[9].mxu1  ;;  %v1244_v21 = vsel %vm751_vm3, %v1237_v19, -inf }
 0x5bb   : > { %1245 = vmax.xlane.f32.xlu0 %v1244_v21 }
 0x5d1   : > { %1345 = vrot.lane.b32.xlu0 %v3644_v39, %s3418_s24 }
 0x5d5   : > { %1583 = vrot.lane.b32.xlu0 %v3652_v42, %s3419_s17 }
 0x5d9   : > { %1661 = vrot.lane.b32.xlu0 %v3661_v44, %s3419_s17 }
 0x5ee   : > { %v3703_v22 = vpop.f32.mrb[0].mxu0 }
 0x5ef   : > { %v3061_v23 = vpop.f32.mrb[1].mxu0 }
 0x5f0   : > { %v744_v23 = vld [vmem:[%s3580_s0 + $0x10] sm:$0xff] }
 0x5f2   : > { %v1159_v24 = vpop.f32.mrb[2].mxu0 }
 0x5f3   : > { %v3071_v25 = vpop.f32.mrb[3].mxu0  ;;  %v1241_v32 = vsel %vm751_vm3, %v1159_v24, -inf }
 0x648   : > { %v1246_v26 = vpop.xlane.xlu0 %1245 }
 0x649   : > { %v1248_v27 = vsub.f32 %v1237_v19, %v1246_v26 }
 0x64b   : > { %v1251_v28 = vmul.f32 1.442695, %v1248_v27 }
 0x64c   : > { %v1346_v29 = vpop.permute.xlu0 %1345 }
 0x64d   : > { %3287 = vpow2.f32 %v1251_v28  ;;  %3083 = vmatpush3.msra.mxu1 %v1346_v29 }
 0x64e   : > { %3097 = vmatprep.subr.mxu1 %v3412_v38 }
 0x650   : > { %v1584_v45 = vpop.permute.xlu0 %1583 }
 0x654   : > { %v1662_v47 = vpop.permute.xlu0 %1661 }
 0x657   : > { %v3288_v30 = vpop.eup %3287 }
 0x658   : > { %v1256_v31 = vsel %vm751_vm3, %v3288_v30, 0.0 }
 0x659   : > { %1257 = vadd.xlane.f32.xlu1 %v1256_v31 }
 0x66a   : > { %1585 = vrot.lane.b32.xlu1 %v3647_v40, %s3420_s25 }
 0x66e   : > { %1663 = vrot.lane.b32.xlu1 %v3644_v39, %s3420_s25  ;;  %s3915_s25 = sadd.s32 4294967295, %s3407_s23  }
 0x66f   : > { %p3840_p6 = scmp.eq.s32.totalorder %s3915_s25, 1 }
 0x692   : > { %1242 = vmax.xlane.f32.xlu1 %v1241_v32 }
 0x6e6   : > { %v1258_v33 = vpop.xlane.xlu1 %1257 }
 0x6e7   : > { %3289 = vrcp.f32 %v1258_v33 }
 0x6ea   : > { %v1586_v43 = vpop.permute.xlu1 %1585 }
 0x6ee   : > { %v1664_v46 = vpop.permute.xlu1 %1663 }
 0x6f1   : > { %v3290_v34 = vpop.eup %3289 }
 0x6f2   : > { %v1262_v35 = vmul.f32 %v3290_v34, %v1258_v33 }
 0x6f4   : > { %v1264_v36 = vsub.f32 2.0, %v1262_v35 }
 0x6f6   : > { %v1266_v37 = vmul.f32 %v3290_v34, %v1264_v36 }
 0x6f8   : > { %v1268_v41 = vmul.f32 %v3288_v30, %v1266_v37 }
 0x6fa   : > { %3085 = vmatmul.mubr.msk.f32.vlgmr.msra.gmra.mrb[10].mxu1 %vm751_vm3, %v1268_v41 }
 0x6fb   : > { %3098 = vmatpush3.xpose.msk.msra.mxu1 %vm751_vm3, %v1586_v43  ;;  %3099 = vmatprep.mubr.msk.f32.mxu1 %vm3413_vm2, %v3412_v38 }
 0x6fc   : > { %3102 = vmatprep.subr.mxu1 %v3412_v38 }
 0x6fe   : > { %3100 = vmatmul.mubr.msk.f32.vlgmr.msra.gmra.mrb[12].mxu1 %vm751_vm3, %v1584_v45 }
 0x6ff   : > { %3103 = vmatpush3.xpose.msk.msra.mxu1 %vm751_vm3, %v1664_v46  ;;  %3104 = vmatprep.mubr.msk.f32.mxu1 %vm3413_vm2, %v3412_v38 }
 0x700   : > { %3112 = vmatprep.subr.mxu1 %v3412_v38 }
 0x702   : > { %3105 = vmatmul.mubr.msk.f32.vlgmr.msra.gmra.mrb[14].mxu1 %vm751_vm3, %v1662_v47 }
 0x703   : > { %3114 = vmatprep.mubr.msk.f32.mxu1 %vm3413_vm2, %v3412_v38 }
 0x71f   : > { %v1243_v48 = vpop.xlane.xlu1 %1242 }
 0x720   : > { %v1247_v49 = vsub.f32 %v1159_v24, %v1243_v48 }
 0x722   : > { %v1249_v50 = vmul.f32 1.442695, %v1247_v49 }
 0x724   : > { %3291 = vpow2.f32 %v1249_v50 }
 0x72e   : > { %v3292_v51 = vpop.eup %3291 }
 0x72f   : > { %v1253_v52 = vsel %vm751_vm3, %v3292_v51, 0.0 }
 0x730   : > { %1254 = vadd.xlane.f32.xlu0 %v1253_v52 }
 0x746   : > { %1269 = vrot.lane.b32.xlu0 %v3647_v40, %s3418_s24  ;;  %s3426_s24 = smov [#allocation5]  }
 0x747   : > { %s2736_s17 = sshll.u32 %s3426_s24, 4  ;;  %s2737_s17 = int_to_ptr.vmem [resolvable:$true] %s2736_s17 }
 0x748   : > { %p3358_p12 = scmp.lt.s32.totalorder %s2737_s17, %s2737_s17 }
 0x74a   : > { %1843 = vrot.lane.b32.xlu0 %v3644_v39, %s3421_s26 }
 0x74e   : > { %2004 = vrot.lane.b32.xlu0 %v3647_v40, %s3422_s4 }
 0x752   : > { %2082 = vrot.lane.b32.xlu0 %v3644_v39, %s3422_s4 }
 0x756   : > { %2002 = vrot.lane.b32.xlu0 %v3652_v42, %s3423_s21 }
 0x7bd   : > { %v1255_v53 = vpop.xlane.xlu0 %1254 }
 0x7be   : > { %3293 = vrcp.f32 %v1255_v53 }
 0x7c1   : > { %v1270_v54 = vpop.permute.xlu0 %1269 }
 0x7c2   : > { %3078 = vmatpush3.msra.mxu0 %v1270_v54 }
 0x7c3   : > { %3087 = vmatprep.subr.mxu0 %v743_v6 }
 0x7c5   : > { %v1844_v55 = vpop.permute.xlu0 %1843 }
 0x7c6   : > { %3113 = vmatpush3.msra.mxu1 %v1844_v55 }
 0x7c7   : > { %3122 = vmatprep.subr.mxu1 %v3412_v38 }
 0x7c8   : > { %v3294_v56 = vpop.eup %3293 }
 0x7c9   : > { %v1261_v57 = vmul.f32 %v3294_v56, %v1255_v53  ;;  %v2005_v28 = vpop.permute.xlu0 %2004 }
 0x7cb   : > { %v1263_v58 = vsub.f32 2.0, %v1261_v57 }
 0x7cd   : > { %v1265_v59 = vmul.f32 %v3294_v56, %v1263_v58  ;;  %v1417_v60 = vpop.f32.mrb[10].mxu1  ;;  %v2083_v33 = vpop.permute.xlu0 %2082 }
 0x7ce   : > { %v3086_v61 = vpop.f32.mrb[11].mxu1 }
 0x7cf   : > { %v1267_v62 = vmul.f32 %v3292_v51, %v1265_v59 }
 0x7d1   : > { %3080 = vmatmul.mubr.msk.f32.vlgmr.msra.gmra.mrb[4].mxu0 %vm751_vm3, %v1267_v62  ;;  %v1657_v42 = vpop.f32.mrb[12].mxu1  ;;  %v2003_v35 = vpop.permute.xlu0 %2002 }
 0x7d2   : > { %v3101_v63 = vpop.f32.mrb[13].mxu1  ;;  %v1739_v0 = vsel %vm751_vm3, %v1657_v42, -inf  ;;  %3088 = vmatpush3.msra.mxu0 %v743_v6 }
 0x7d3   : > { %1740 = vmax.xlane.f32.xlu1 %v1739_v0  ;;  %3092 = vmatprep.subr.mxu0 %v742_v7 }
 0x7d5   : > { %v1735_v1 = vpop.f32.mrb[14].mxu1 }
 0x7d6   : > { %v3106_v4 = vpop.f32.mrb[15].mxu1  ;;  %v1742_v5 = vsel %vm751_vm3, %v1735_v1, -inf }
 0x7d7   : > { %1743 = vmax.xlane.f32.xlu1 %v1742_v5 }
 0x860   : > { %v1741_v8 = vpop.xlane.xlu1 %1740 }
 0x861   : > { %v1745_v9 = vsub.f32 %v1657_v42, %v1741_v8 }
 0x863   : > { %v1747_v10 = vmul.f32 1.442695, %v1745_v9 }
 0x864   : > { %v1744_v11 = vpop.xlane.xlu1 %1743 }
 0x865   : > { %3295 = vpow2.f32 %v1747_v10  ;;  %v1746_v12 = vsub.f32 %v1735_v1, %v1744_v11  ;;  %v745_v10 = vld [vmem:[%s3580_s0 + $0x18] sm:$0xff] }
 0x867   : > { %v1749_v13 = vmul.f32 1.442695, %v1746_v12 }
 0x869   : > { %3297 = vpow2.f32 %v1749_v13 }
 0x86f   : > { %v3296_v14 = vpop.eup %3295 }
 0x870   : > { %v1751_v15 = vsel %vm751_vm3, %v3296_v14, 0.0 }
 0x871   : > { %1752 = vadd.xlane.f32.xlu1 %v1751_v15 }
 0x873   : > { %v3298_v16 = vpop.eup %3297 }
 0x874   : > { %v1754_v18 = vsel %vm751_vm3, %v3298_v16, 0.0 }
 0x875   : > { %1755 = vadd.xlane.f32.xlu1 %v1754_v18 }
 0x886   : > { %1767 = vrot.lane.b32.xlu1 %v3647_v40, %s3421_s26 }
 0x88a   : > { %2080 = vrot.lane.b32.xlu1 %v3661_v44, %s3423_s21 }
 0x8a4   : > { %v1341_v19 = vpop.f32.mrb[4].mxu0 }
 0x8a5   : > { %v3081_v20 = vpop.f32.mrb[5].mxu0  ;;  %3089 = vmatprep.mubr.msk.f32.mxu0 %vm751_vm3, %v1341_v19 }
 0x8a6   : > { %3090 = vmatmul.mubr.msk.f32.vlgmr.msra.gmra.mrb[6].mxu0 %vm751_vm3, %v1417_v60 }
 0x8a7   : > { %3094 = vmatprep.mubr.msk.f32.mxu0 %vm751_vm3, %v3703_v22  ;;  %3093 = vmatpush3.msra.mxu0 %v742_v7 }
 0x8a8   : > { %3107 = vmatprep.subr.mxu0 %v3412_v38 }
 0x8ae   : > { %3095 = vmatmul.mubr.msk.f32.vlgmr.msra.gmra.mrb[6].mxu0 %vm751_vm3, %v3696_v17 }
 0x8af   : > { %3109 = vmatprep.mubr.msk.f32.mxu0 %vm3413_vm2, %v3412_v38 }
 0x8fe   : > { %v1753_v21 = vpop.xlane.xlu1 %1752 }
 0x8ff   : > { %3299 = vrcp.f32 %v1753_v21 }
 0x902   : > { %v1756_v44 = vpop.xlane.xlu1 %1755 }
 0x903   : > { %3301 = vrcp.f32 %v1756_v44 }
 0x906   : > { %v1768_v24 = vpop.permute.xlu1 %1767 }
 0x907   : > { %3108 = vmatpush3.msra.mxu0 %v1768_v24 }
 0x908   : > { %3117 = vmatprep.subr.mxu0 %v744_v23 }
 0x909   : > { %v3300_v25 = vpop.eup %3299 }
 0x90a   : > { %v1759_v26 = vmul.f32 %v3300_v25, %v1753_v21  ;;  %v2081_v45 = vpop.permute.xlu1 %2080 }
 0x90c   : > { %v1761_v22 = vsub.f32 2.0, %v1759_v26 }
 0x90d   : > { %v3302_v27 = vpop.eup %3301 }
 0x90e   : > { %v1763_v29 = vmul.f32 %v3300_v25, %v1761_v22  ;;  %v1760_v30 = vmul.f32 %v3302_v27, %v1756_v44 }
 0x910   : > { %v1765_v31 = vmul.f32 %v3296_v14, %v1763_v29  ;;  %v1762_v17 = vsub.f32 2.0, %v1760_v30 }
 0x912   : > { %v1764_v32 = vmul.f32 %v3302_v27, %v1762_v17  ;;  %3110 = vmatmul.mubr.msk.f32.vlgmr.msra.gmra.mrb[8].mxu0 %vm751_vm3, %v1765_v31  ;;  %v2476_v17 = vld [vmem:[%s3593_s13] sm:$0xff] }
 0x913   : > { %3118 = vmatpush3.msra.mxu0 %v744_v23 }
 0x914   : > { %v1766_v34 = vmul.f32 %v3298_v16, %v1764_v32  ;;  %3127 = vmatprep.subr.mxu0 %v3412_v38  ;;  %v2953_v16 = vld [vmem:[%s3913_s29] ss:$0 sm:$0xff]  ;;  %v2477_v32 = vld [vmem:[%s3593_s13 + $0x8] sm:$0xff] }
 0x916   : > { %3115 = vmatmul.mubr.msk.f32.vlgmr.msra.gmra.mrb[16].mxu1 %vm751_vm3, %v1766_v34  ;;  %v2478_v34 = vld [vmem:[%s3593_s13 + $0x10] sm:$0xff] }
 0x917   : > { %3123 = vmatpush3.xpose.msk.msra.mxu1 %vm751_vm3, %v2005_v28  ;;  %3124 = vmatprep.mubr.msk.f32.mxu1 %vm3413_vm2, %v3412_v38 }
 0x918   : > { %3132 = vmatprep.subr.mxu1 %v3412_v38 }
 0x91a   : > { %3125 = vmatmul.mubr.msk.f32.vlgmr.msra.gmra.mrb[18].mxu1 %vm751_vm3, %v2003_v35  ;;  %v2479_v35 = vld [vmem:[%s3593_s13 + $0x18] sm:$0xff]  ;;  %s3914_s13 = scalar_lea.vmem %s3884_s6, %s3557_s15 }
 0x91b   : > { %3134 = vmatprep.mubr.msk.f32.mxu1 %vm3413_vm2, %v3412_v38 }
 0x9e5   : > { %v1839_v36 = vpop.f32.mrb[8].mxu0 }
 0x9e6   : > { %v3111_v37 = vpop.f32.mrb[9].mxu0  ;;  %3119 = vmatprep.mubr.msk.f32.mxu0 %vm751_vm3, %v1839_v36  ;;  %v3189_v36 = vpack.c.bf16 %v2479_v35, %v2478_v34 }
 0x9e9   : > { %v1915_v41 = vpop.f32.mrb[16].mxu1 }
 0x9ea   : > { %v3116_v43 = vpop.f32.mrb[17].mxu1  ;;  %3120 = vmatmul.mubr.msk.f32.vlgmr.msra.gmra.mrb[6].mxu0 %vm751_vm3, %v1915_v41 }
 0x9eb   : > { %3128 = vmatpush3.xpose.msk.msra.mxu0 %vm751_vm3, %v2083_v33  ;;  %3129 = vmatprep.mubr.msk.f32.mxu0 %vm3413_vm2, %v3412_v38  ;;  %v3185_v33 = vpack.c.bf16 %v2477_v32, %v2476_v17 }
 0x9ec   : > { %3137 = vmatprep.subr.mxu0 %v3412_v38 }
 0x9ed   : > { %v2076_v46 = vpop.f32.mrb[18].mxu1 }
 0x9ee   : > { %v3126_v47 = vpop.f32.mrb[19].mxu1  ;;  %3130 = vmatmul.mubr.msk.f32.vlgmr.msra.gmra.mrb[10].mxu0 %vm751_vm3, %v2081_v45  ;;  %v2158_v48 = vsel %vm751_vm3, %v2076_v46, -inf }
 0x9ef   : > { %2159 = vmax.xlane.f32.xlu0 %v2158_v48  ;;  %3139 = vmatprep.mubr.msk.f32.mxu0 %vm3413_vm2, %v3412_v38 }
 0xa7c   : > { %v2160_v49 = vpop.xlane.xlu0 %2159 }
 0xa7d   : > { %v2164_v50 = vsub.f32 %v2076_v46, %v2160_v49  ;;  %v2954_v49 = vld [vmem:[%s3914_s13] ss:$0 sm:$0xff] }
 0xa7f   : > { %v2166_v51 = vmul.f32 1.442695, %v2164_v50 }
 0xa81   : > { %3303 = vpow2.f32 %v2166_v51 }
 0xa8b   : > { %v3304_v52 = vpop.eup %3303 }
 0xa8c   : > { %v2170_v53 = vsel %vm751_vm3, %v3304_v52, 0.0 }
 0xa8d   : > { %2171 = vadd.xlane.f32.xlu0 %v2170_v53  ;;  %v2955_v53 = vld [vmem:[%s582_s22] ss:$0 sm:$0xff] }
 0xac1   : > { %v2154_v54 = vpop.f32.mrb[10].mxu0 }
 0xac2   : > { %v3131_v55 = vpop.f32.mrb[11].mxu0  ;;  %v2161_v56 = vsel %vm751_vm3, %v2154_v54, -inf }
 0xac3   : > { %2162 = vmax.xlane.f32.xlu1 %v2161_v56 }
 0xad4   : > { %2262 = vrot.lane.b32.xlu1 %v3644_v39, %s3424_s18 }
 0xb1a   : > { %v2172_v62 = vpop.xlane.xlu0 %2171 }
 0xb50   : > { %v2163_v57 = vpop.xlane.xlu1 %2162 }
 0xb51   : > { %v2165_v58 = vsub.f32 %v2154_v54, %v2163_v57 }
 0xb53   : > { %v2168_v59 = vmul.f32 1.442695, %v2165_v58  ;;  %v2626_v58 = vld [vmem:[%s3607_s27] sm:$0xff] }
 0xb54   : > { %v2263_v38 = vpop.permute.xlu1 %2262 }
 0xb55   : > { %3305 = vpow2.f32 %v2168_v59  ;;  %3138 = vmatpush3.msra.mxu0 %v2263_v38  ;;  %v2627_v59 = vld [vmem:[%s3607_s27 + $0x8] sm:$0xff] }
 0xb56   : > { %3307 = vrcp.f32 %v2172_v62  ;;  %3142 = vmatprep.subr.mxu0 %v745_v10  ;;  %v3193_v38 = vpack.c.bf16 %v2627_v59, %v2626_v58  ;;  %v3425_v58 = vmov 1.0  }
 0xb5f   : > { %v3306_v60 = vpop.eup %3305 }
 0xb60   : > { %v2173_v61 = vsel %vm751_vm3, %v3306_v60, 0.0  ;;  %v3308_v42 = vpop.eup %3307 }
 0xb61   : > { %2174 = vadd.xlane.f32.xlu0 %v2173_v61  ;;  %v2178_v63 = vmul.f32 %v3308_v42, %v2172_v62  ;;  %v2629_v61 = vld [vmem:[%s3607_s27 + $0x18] sm:$0xff] }
 0xb63   : > { %v2180_v0 = vsub.f32 2.0, %v2178_v63  ;;  %v2631_v63 = vld [vmem:[%s3607_s27 + $0x28] sm:$0xff] }
 0xb65   : > { %v2182_v1 = vmul.f32 %v3308_v42, %v2180_v0  ;;  %v2630_v42 = vld [vmem:[%s3607_s27 + $0x20] sm:$0xff] }
 0xb66   : > { %v3201_v0 = vpack.c.bf16 %v2631_v63, %v2630_v42 }
 0xb67   : > { %v2184_v4 = vmul.f32 %v3304_v52, %v2182_v1  ;;  %v2632_v1 = vld [vmem:[%s3607_s27 + $0x30] sm:$0xff] }
 0xb77   : > { %2186 = vrot.lane.b32.xlu0 %v3647_v40, %s3424_s18 }
 0xbee   : > { %v2175_v39 = vpop.xlane.xlu0 %2174 }
 0xbef   : > { %3309 = vrcp.f32 %v2175_v39 }
 0xbf2   : > { %v2187_v5 = vpop.permute.xlu0 %2186 }
 0xbf3   : > { %3133 = vmatpush3.msra.mxu1 %v2187_v5  ;;  %v2956_v5 = vld [vmem:[%s590_s3] ss:$0 sm:$0xff] }
 0xbf4   : > { %3135 = vmatmul.mubr.msk.f32.vlgmr.msra.gmra.mrb[20].mxu1 %vm751_vm3, %v2184_v4  ;;  %3186 = vmatprep.subr.bf16.mxu1 %v3185_v33 }
 0xbf5   : > { %3188 = vmatpush3.bf16.msra.mxu1 %v3185_v33 }
 0xbf6   : > { %3190 = vmatprep.subr.bf16.mxu1 %v3189_v36 }
 0xbf9   : > { %v3310_v6 = vpop.eup %3309  ;;  %3192 = vmatpush3.bf16.msra.mxu1 %v3189_v36 }
 0xbfa   : > { %v2179_v7 = vmul.f32 %v3310_v6, %v2175_v39  ;;  %v2633_v39 = vld [vmem:[%s3607_s27 + $0x38] sm:$0xff] }
 0xbfb   : > { %v3205_v4 = vpack.c.bf16 %v2633_v39, %v2632_v1 }
 0xbfc   : > { %v2181_v8 = vsub.f32 2.0, %v2179_v7 }
 0xbfe   : > { %v2183_v9 = vmul.f32 %v3310_v6, %v2181_v8 }
 0xc00   : > { %v2185_v40 = vmul.f32 %v3306_v60, %v2183_v9  ;;  %v2628_v60 = vld [vmem:[%s3607_s27 + $0x10] sm:$0xff] }
 0xc01   : > { %v3197_v62 = vpack.c.bf16 %v2629_v61, %v2628_v60 }
 0xc02   : > { %3140 = vmatmul.mubr.msk.f32.vlgmr.msra.gmra.mrb[12].mxu0 %vm751_vm3, %v2185_v40 }
 0xc03   : > { %3143 = vmatpush3.msra.mxu0 %v745_v10 }
 0xc04   : > { %3194 = vmatprep.subr.bf16.mxu0 %v3193_v38 }
 0xcc7   : > { %v2258_v11 = vpop.f32.mrb[20].mxu1 }
 0xcc8   : > { %v3136_v12 = vpop.f32.mrb[21].mxu1  ;;  %3144 = vmatprep.mubr.msk.f32.mxu0 %vm751_vm3, %v2258_v11 }
 0xcd5   : > { %v2334_v13 = vpop.f32.mrb[12].mxu0 }
 0xcd6   : > { %v3141_v14 = vpop.f32.mrb[13].mxu0  ;;  %3145 = vmatmul.mubr.msk.f32.vlgmr.msra.gmra.mrb[6].mxu0 %vm751_vm3, %v2334_v13 }
 0xcd7   : > { %3196 = vmatpush3.bf16.msra.mxu0 %v3193_v38 }
 0xcd8   : > { %3198 = vmatprep.subr.bf16.mxu0 %v3197_v62 }
 0xcdb   : > { %3200 = vmatpush3.bf16.msra.mxu0 %v3197_v62 }
 0xcdc   : > { %3202 = vmatprep.subr.bf16.mxu0 %v3201_v0 }
 0xcdf   : > { %3204 = vmatpush3.bf16.msra.mxu0 %v3201_v0 }
 0xce0   : > { %3206 = vmatprep.subr.bf16.mxu0 %v3205_v4 }
 0xce3   : > { %3208 = vmatpush3.bf16.msra.mxu0 %v3205_v4 }
 0xda9   : > { %v3146_v15 = vpop.f32.mrb[6].mxu0 }
 0xdaa   : > { %v2422_v18 = vadd.f32 %v3146_v15, %v3612_v3  ;;  %v2410_v19 = vpop.f32.mrb[7].mxu0 }
 0xdab   : > { %v2421_v20 = vadd.f32 %v2410_v19, %v3610_v2 }
 0xdac   : > { %v3791_v21 = vadd.f32 %v2953_v16, %v2422_v18 }
 0xdad   : > { %v3793_v44 = vadd.f32 %v2953_v16, %v2421_v20 }
 0xdae   : > { %v2437_v23 = vsel %vm613_vm1, %v3791_v21, 0.0 }
 0xdaf   : > { %2438 = vadd.xlane.f32.xlu0 %v2437_v23  ;;  %v2434_v24 = vsel %vm613_vm1, %v3793_v44, 0.0 }
 0xdb0   : > { %2435 = vadd.xlane.f32.xlu1 %v2434_v24 }
 0xe3c   : > { %v2439_v25 = vpop.xlane.xlu0 %2438 }
 0xe3d   : > { %v2441_v3 = vmul.f32 0.03125, %v2439_v25  ;;  %v2436_v26 = vpop.xlane.xlu1 %2435 }
 0xe3e   : > { %v2440_v2 = vmul.f32 0.03125, %v2436_v26 }
 0xe3f   : > { %v2443_v22 = vsub.f32 %v3791_v21, %v2441_v3 }
 0xe40   : > { %v2442_v27 = vsub.f32 %v3793_v44, %v2440_v2 }
 0xe41   : > { %v2445_v28 = vmul.f32 %v2443_v22, %v2443_v22 }
 0xe42   : > { %v2444_v29 = vmul.f32 %v2442_v27, %v2442_v27 }
 0xe43   : > { %v2449_v30 = vsel %vm613_vm1, %v2445_v28, 0.0 }
 0xe44   : > { %2450 = vadd.xlane.f32.xlu1 %v2449_v30  ;;  %v2446_v31 = vsel %vm613_vm1, %v2444_v29, 0.0 }
 0xe45   : > { %2447 = vadd.xlane.f32.xlu0 %v2446_v31 }
 0xed1   : > { %v2451_v37 = vpop.xlane.xlu1 %2450 }
 0xed2   : > { %v2453_v41 = vmul.f32 0.03125, %v2451_v37  ;;  %v2448_v43 = vpop.xlane.xlu0 %2447 }
 0xed3   : > { %v2452_v45 = vmul.f32 0.03125, %v2448_v43 }
 0xed4   : > { %v2455_v46 = vadd.f32 1e-05, %v2453_v41 }
 0xed5   : > { %v2454_v47 = vadd.f32 1e-05, %v2452_v45 }
 0xed6   : > { %3311 = vrsqrt.f32 %v2455_v46 }
 0xed7   : > { %3313 = vrsqrt.f32 %v2454_v47 }
 0xee0   : > { %v3312_v48 = vpop.eup %3311 }
 0xee1   : > { %v3314_v50 = vpop.eup %3313  ;;  %v2459_v51 = vmul.f32 %v3312_v48, %v2443_v22 }
 0xee2   : > { %v2458_v52 = vmul.f32 %v3314_v50, %v2442_v27 }
 0xee3   : > { %v2467_v54 = vmul.f32 %v2954_v49, %v2459_v51 }
 0xee4   : > { %v2466_v55 = vmul.f32 %v2954_v49, %v2458_v52 }
 0xee5   : > { %v2475_v57 = vadd.f32 %v2955_v53, %v2467_v54 }
 0xee6   : > { %v2474_v56 = vadd.f32 %v2955_v53, %v2466_v55 }
 0xee8   : > { %3155 = vmatprep.mubr.msk.f32.mxu1 %vm613_vm1, %v2474_v56 }
 0xee9   : > { %3156 = vmatmul.mubr.msk.f32.vlgmr.msra.gmra.mrb[22].mxu1 %vm613_vm1, %v2475_v57 }
 0xfbc   : > { %v3157_v6 = vpop.f32.mrb[22].mxu1 }
 0xfbd   : > { %v2565_v7 = vadd.f32 %v3157_v6, %v2956_v5  ;;  %v2559_v8 = vpop.f32.mrb[23].mxu1 }
 0xfbe   : > { %v2560_v9 = vadd.f32 %v2956_v5, %v2559_v8  ;;  %v2959_v5 = vld [vmem:[%s598_s12] ss:$0 sm:$0xff]  ;;  %s3351_s12 = scalar_lea.vmem %s2737_s17, 256 }
 0xfbf   : > { %v2571_v40 = vmul.f32 0.70710677, %v2565_v7  ;;  %v2569_v1 = vmul.f32 0.5, %v2565_v7  ;;  %p3352_p8 = scmp.ne.s32.totalorder %s2737_s17, %s3351_s12  ;;  %p3359_p13 = scmp.lt.s32.totalorder %s3351_s12, %s3351_s12 }
 0xfc0   : > { %v2570_v10 = vmul.f32 0.70710677, %v2560_v9  ;;  %v2568_v63 = vmul.f32 0.5, %v2560_v9 }
 0xfc1   : > { %v2577_v11 = vand.u32 2147483647, %v2571_v40  ;;  %vm2573_vm4 = vcmp.lt.f32.partialorder %v2571_v40, 0.0  ;;  %p3353_p10 = pnand %p3352_p8, %p3840_p6  ;;  %p3360_p0 = por %p3359_p13, %p3358_p12 }
 0xfc2   : > { %v2576_v12 = vand.u32 2147483647, %v2570_v10  ;;  %vm2572_vm5 = vcmp.lt.f32.partialorder %v2570_v10, 0.0  ;;  %v2575_v59 = vsel %vm2573_vm4, -1.0, %v3425_v58 }
 0xfc3   : > { %v2579_v13 = vmul.f32 0.3275911, %v2577_v11  ;;  %v2609_v23 = vsub.f32 0.0, %v2577_v11  ;;  %v2574_v61 = vsel %vm2572_vm5, -1.0, %v3425_v58  ;;  %p3354_p11 = pneg %p3353_p10 }
 0xfc4   : > { %v2578_v14 = vmul.f32 0.3275911, %v2576_v12  ;;  %v2608_v3 = vsub.f32 0.0, %v2576_v12 }
 0xfc5   : > { %v2581_v15 = vadd.f32 1.0, %v2579_v13  ;;  %v2611_v22 = vmul.f32 %v2609_v23, %v2577_v11  ;;  %p3361_p1 = pnand %p3360_p0, %p3354_p11 }
 0xfc6   : > { %v2580_v16 = vadd.f32 1.0, %v2578_v14  ;;  %v2610_v29 = vmul.f32 %v2608_v3, %v2576_v12 }
 0xfc7   : > { %3315 = vrcp.f32 %v2581_v15  ;;  %v2614_v17 = vmul.f32 1.442695, %v2611_v22 }
 0xfc8   : > { %3317 = vrcp.f32 %v2580_v16  ;;  %v2612_v34 = vmul.f32 1.442695, %v2610_v29 }
 0xfc9   : > { %3319 = vpow2.f32 %v2614_v17 }
 0xfca   : > { %3321 = vpow2.f32 %v2612_v34 }
 0xfd1   : > { %v3316_v18 = vpop.eup %3315 }
 0xfd2   : > { %v3318_v19 = vpop.eup %3317  ;;  %v2585_v20 = vmul.f32 %v3316_v18, %v2581_v15 }
 0xfd3   : > { %v2584_v24 = vmul.f32 %v3318_v19, %v2580_v16  ;;  %v3320_v52 = vpop.eup %3319 }
 0xfd4   : > { %v2587_v25 = vsub.f32 2.0, %v2585_v20  ;;  %v3322_v54 = vpop.eup %3321 }
 0xfd5   : > { %v2586_v26 = vsub.f32 2.0, %v2584_v24 }
 0xfd6   : > { %v2589_v2 = vmul.f32 %v3316_v18, %v2587_v25 }
 0xfd7   : > { %v2588_v27 = vmul.f32 %v3318_v19, %v2586_v26 }
 0xfd8   : > { %v2591_v28 = vmul.f32 1.0614054, %v2589_v2 }
 0xfd9   : > { %v2590_v30 = vmul.f32 1.0614054, %v2588_v27 }
 0xfda   : > { %v2593_v31 = vadd.f32 -1.4531521, %v2591_v28 }
 0xfdb   : > { %v2592_v32 = vadd.f32 -1.4531521, %v2590_v30 }
 0xfdc   : > { %v2595_v33 = vmul.f32 %v2593_v31, %v2589_v2 }
 0xfdd   : > { %v2594_v35 = vmul.f32 %v2592_v32, %v2588_v27 }
 0xfde   : > { %v2597_v36 = vadd.f32 1.4214138, %v2595_v33 }
 0xfdf   : > { %v2596_v37 = vadd.f32 1.4214138, %v2594_v35 }
 0xfe0   : > { %v2599_v41 = vmul.f32 %v2597_v36, %v2589_v2 }
 0xfe1   : > { %v2598_v43 = vmul.f32 %v2596_v37, %v2588_v27 }
 0xfe2   : > { %v2601_v45 = vadd.f32 -0.28449672, %v2599_v41 }
 0xfe3   : > { %v2600_v46 = vadd.f32 -0.28449672, %v2598_v43 }
 0xfe4   : > { %v2603_v47 = vmul.f32 %v2601_v45, %v2589_v2 }
 0xfe5   : > { %v2602_v48 = vmul.f32 %v2600_v46, %v2588_v27 }
 0xfe6   : > { %v2605_v49 = vadd.f32 0.2548296, %v2603_v47 }
 0xfe7   : > { %v2604_v50 = vadd.f32 0.2548296, %v2602_v48 }
 0xfe8   : > { %v2607_v51 = vmul.f32 %v2605_v49, %v2589_v2 }
 0xfe9   : > { %v2606_v53 = vmul.f32 %v2604_v50, %v2588_v27 }
 0xfea   : > { %v2617_v55 = vmul.f32 %v3320_v52, %v2607_v51 }
 0xfeb   : > { %v2616_v56 = vmul.f32 %v3322_v54, %v2606_v53 }
 0xfec   : > { %v2619_v57 = vsub.f32 1.0, %v2617_v55 }
 0xfed   : > { %v2618_v38 = vsub.f32 1.0, %v2616_v56 }
 0xfee   : > { %v2621_v60 = vmul.f32 %v2619_v57, %v2575_v59 }
 0xfef   : > { %v2620_v62 = vmul.f32 %v2618_v38, %v2574_v61 }
 0xff0   : > { %v2623_v42 = vadd.f32 1.0, %v2621_v60 }
 0xff1   : > { %v2622_v0 = vadd.f32 1.0, %v2620_v62 }
 0xff2   : > { %v2625_v4 = vmul.f32 %v2623_v42, %v2569_v1 }
 0xff3   : > { %v2624_v39 = vmul.f32 %v2622_v0, %v2568_v63 }
 0xff5   : > { %3174 = vmatprep.mubr.msk.f32.mxu0 %vm2641_vm6, %v2624_v39 }
 0xff6   : > { %3175 = vmatmul.mubr.msk.f32.vlgmr.msra.gmra.mrb[14].mxu0 %vm2641_vm6, %v2625_v4 }
0x10c9   : > { %v3176_v6 = vpop.f32.mrb[14].mxu0 }
0x10ca   : > { %v2720_v8 = vadd.f32 %v3176_v6, %v2959_v5  ;;  %v2714_v40 = vpop.f32.mrb[15].mxu0 }
0x10cb   : > { %v2715_v10 = vadd.f32 %v2959_v5, %v2714_v40 }
0x10cc   : > { %v2724_v9 = vadd.f32 %v2720_v8, %v3791_v21 }
0x10cd   : > { %v2723_v7 = vadd.f32 %v2715_v10, %v3793_v44 }
0x10ce   : > { %2726 = vst.msk [vmem:[#allocation5 + $0x8] sm:$0xff] %vm613_vm1, %v2724_v9 }
0x10cf   : > { %2725 = vst.msk [vmem:[#allocation5] sm:$0xff] %vm613_vm1, %v2723_v7 }
0x10d0   : > { %3364 = shalt.err (!%p3361_p1)
}
0x10d1   : > { %s3917_s21 = sld [smem:[#allocation13_spill]] }
0x10d7   : > { %s3918_s18 = smov %s3917_s21  ;;  %s3365_s19 = scalar_lea.hbm %s3917_s21, 256 }
0x10d8   : > { %p3366_p2 = scmp.ne.s32.totalorder %s3918_s18, %s3365_s19  ;;  %p3371_p9 = scmp.lt.u32.totalorder %s3365_s19, %s3918_s18 }
0x10da   : > { %p3367_p5 = pnand %p3366_p2, %p3840_p6 }
0x10dc   : > { %p3368_p7 = pneg %p3367_p5 }
0x10de   : > { %p3373_p3 = pnand %p3371_p9, %p3368_p7 }
0x10e0   : > { %3376 = shalt.err (!%p3373_p3)
}
0x10e1   : > { %s3427_s13 = smov 128   ;;  %s3428_s28 = smov 8  }
0x10e2   : > { %3220 = dma.vmem_to_hbm [thread:$0]  (%p3840_p6), %s2737_s17, 256, %s3918_s18, [#allocation4], %s3427_s13, %s3427_s13, %s3428_s28  }
0x10e3   : > { %3394 = dma.done.wait (%p3840_p6), [#allocation4], 256  }
0x10e4   : > { %3396 = vsyncadd (%p3840_p6), [#allocation4], 4294967040 }
0x10e5 PF: > { %s24_s23 = sadd.s32 1, %s3407_s23   ;;  %s3919_s21 = sld [smem:[#allocation8_spill]] }
0x10e6   : > { %p21_p4 = scmp.ge.s32.totalorder %s24_s23, 4   ;;  %s3920_s22 = sld [smem:[#allocation9_spill]] }
0x10e8   :  { %23 = sbr.rel (!%p21_p4) target bundleno = 8 (0x8), region = 136 }
0x10ef   :  { %2752 = vsyncpa [#allocation3], 1 }
0x10f0   :  { %2754 = vsyncpa [#allocation3 + $0x1], 1 }
0x10f1   :  { %2755 = vsyncpa [#allocation4], 1 }
0x10f2   :  { %2757 = vsyncpa [#allocation4 + $0x1], 1 }

</bundles_post_ra>
